<compile_context>
chip_gen: v7x
topology: tpu7x:2x2x1
jax: 0.10.0
libtpu: 0.0.40
codegen_flags: <defaults>
</compile_context>

<pallas_src>
import functools
import random

import jax
import jax.numpy as jnp
from jax.experimental import pallas as pl
from jax.experimental.pallas import tpu as pltpu


# ----------------------------------------------------------------------------
# Fused encoder + decoder kernel (gridless: single invocation, all in VMEM)
# ----------------------------------------------------------------------------
def seq2seq_kernel(x_flat_ref,        # VMEM (T_in*B, D_in)       time-major flattened input
                   teacher_ref,       # VMEM (T_out, B, D_out)    time-major teacher sequence
                   enc_wih_ref,       # VMEM (D_in, 3H)           gates concatenated [r|z|n]
                   enc_whh_ref,       # VMEM (H, 3H)
                   enc_bih_ref,       # VMEM (1, 3H)
                   enc_bhh_ref,       # VMEM (1, 3H)
                   dec_wih_ref,       # VMEM (D_out, 3H)
                   dec_bih_ref,       # VMEM (1, 3H)
                   dec_whh_ext_ref,   # VMEM (H, 3H + D_out)      [Whh_r|z|n | W_out]
                   dec_bhh_ext_ref,   # VMEM (1, 3H + D_out)      [bhh_r|z|n | b_out]
                   out_ref,           # VMEM (T_out, B, D_out)
                   *, tf_flags):      # static tuple of 0/1 teacher-forcing decisions
    T_out, B, Dout = teacher_ref.shape
    TB, _ = x_flat_ref.shape
    H = enc_whh_ref.shape[0]
    H2 = 2 * H
    H3 = 3 * H
    T_in = TB // B

    # ---- Encoder -----------------------------------------------------------
    # Encoder weights only live across the encoder unroll.
    e_whh = enc_whh_ref[...]
    e_bhh = enc_bhh_ref[...]

    # Hoisted input projection: one (T_in*B, D_in) @ (D_in, 3H) matmul,
    # independent of the recurrence (off the serial critical path).
    gi_all = (jnp.dot(x_flat_ref[...], enc_wih_ref[...],
                      preferred_element_type=jnp.float32) + enc_bih_ref[...])

    h = jnp.zeros((B, H), jnp.float32)
    for t in range(T_in):                       # static unroll; static slices
        lo = t * B                              # sublane-aligned (B multiple of 8)
        gi = gi_all[lo:lo + B, :]               # (B, 3H)
        gh = jnp.dot(h, e_whh, preferred_element_type=jnp.float32) + e_bhh
        # Single EUP push for both sigmoid gates (contiguous r|z slab).
        rz = jax.nn.sigmoid(gi[:, :H2] + gh[:, :H2])
        r = rz[:, :H]
        z = rz[:, H:]
        n = jnp.tanh(gi[:, H2:] + r * gh[:, H2:])
        h = (1.0 - z) * n + z * h

    # ---- Decoder -----------------------------------------------------------
    d_wih = dec_wih_ref[...]
    d_bih = dec_bih_ref[...]
    d_whh_ext = dec_whh_ext_ref[...]            # (H, 3H + D_out): [Whh | W_out]
    d_bhh_ext = dec_bhh_ext_ref[...]            # (1, 3H + D_out): [bhh | b_out]

    nxt = jnp.full((B, Dout), -1.0, jnp.float32)   # -1 * ones initial input
    for t in range(T_out):                          # static unroll
        # One fused recurrent matmul: columns [0:3H] are the gate projections
        # of h_{t-1}; columns [3H:] are out_{t-1} = h_{t-1} @ W_out + b_out.
        ghx = (jnp.dot(h, d_whh_ext, preferred_element_type=jnp.float32)
               + d_bhh_ext)
        if t > 0:
            out_prev = ghx[:, H3:]                  # (B, D_out)
            out_ref[t - 1] = out_prev               # VMEM store; HBM writeback once
            if tf_flags[t - 1]:                     # static decision: no select
                nxt = teacher_ref[t - 1]
            else:
                nxt = out_prev

        gi = jnp.dot(nxt, d_wih, preferred_element_type=jnp.float32) + d_bih
        gh = ghx[:, :H3]
        rz = jax.nn.sigmoid(gi[:, :H2] + gh[:, :H2])
        r = rz[:, :H]
        z = rz[:, H:]
        n = jnp.tanh(gi[:, H2:] + r * gh[:, H2:])
        h = (1.0 - z) * n + z * h

    # Last step's output did not get folded into a following matmul.
    out_last = (jnp.dot(h, d_whh_ext[:, H3:], preferred_element_type=jnp.float32)
                + d_bhh_ext[:, H3:])
    out_ref[T_out - 1] = out_last


# ----------------------------------------------------------------------------
# Wrapper: PyTorch (B, T, D) layout <-> in-kernel time-major layout
# ----------------------------------------------------------------------------
def seq2seq_forward(params, in_seq, out_seq, tf_flags):
    B, T_in, Din = in_seq.shape
    _, T_out, Dout = out_seq.shape

    # Time-major flattening matches the kernel's sublane layout; these are
    # trivial XLA ops outside the serial recurrence.
    x_flat = jnp.transpose(in_seq, (1, 0, 2)).reshape(T_in * B, Din)
    teacher_tm = jnp.transpose(out_seq, (1, 0, 2))

    vmem = pl.BlockSpec(memory_space=pltpu.MemorySpace.VMEM)
    kernel = functools.partial(seq2seq_kernel,
                               tf_flags=tuple(int(f) for f in tf_flags))

    out_tm = pl.pallas_call(
        kernel,
        out_shape=jax.ShapeDtypeStruct((T_out, B, Dout), jnp.float32),
        in_specs=[vmem] * 10,
        out_specs=vmem,
    )(x_flat, teacher_tm,
      params["enc_wih"], params["enc_whh"], params["enc_bih"], params["enc_bhh"],
      params["dec_wih"], params["dec_bih"],
      params["dec_whh_ext"], params["dec_bhh_ext"])

    return jnp.transpose(out_tm, (1, 0, 2))          # back to (B, T_out, D_out)


# tf_flags are static (host-side draws, like the torch module's random.random()).
seq2seq_forward_jit = jax.jit(seq2seq_forward, static_argnums=3)


# ----------------------------------------------------------------------------
# Pure-JAX reference for correctness checking (same concatenated-gate layout)
# ----------------------------------------------------------------------------
def seq2seq_reference(params, in_seq, out_seq, tf_flags):
    B, T_in, _ = in_seq.shape
    _, T_out, Dout = out_seq.shape
    H = params["enc_whh"].shape[0]
    H3 = 3 * H

    def gru_cell(x, h, wih, whh, bih, bhh):
        gi = x @ wih + bih
        gh = h @ whh + bhh
        r = jax.nn.sigmoid(gi[:, :H] + gh[:, :H])
        z = jax.nn.sigmoid(gi[:, H:2 * H] + gh[:, H:2 * H])
        n = jnp.tanh(gi[:, 2 * H:] + r * gh[:, 2 * H:])
        return (1.0 - z) * n + z * h

    h = jnp.zeros((B, H), jnp.float32)
    for t in range(T_in):
        h = gru_cell(in_seq[:, t, :], h,
                     params["enc_wih"], params["enc_whh"],
                     params["enc_bih"], params["enc_bhh"])

    d_whh = params["dec_whh_ext"][:, :H3]
    d_bhh = params["dec_bhh_ext"][:, :H3]
    w_out = params["dec_whh_ext"][:, H3:]
    b_out = params["dec_bhh_ext"][:, H3:]

    nxt = -1.0 * jnp.ones((B, Dout), jnp.float32)
    outs = []
    for t in range(T_out):
        h = gru_cell(nxt, h, params["dec_wih"], d_whh, params["dec_bih"], d_bhh)
        o = h @ w_out + b_out
        outs.append(o)
        nxt = out_seq[:, t, :] if int(tf_flags[t]) else o
    return jnp.stack(outs, axis=1)


if __name__ == "__main__":
    # Small deterministic shapes
    B, T_in, T_out = 8, 6, 5
    D_in, D_out, H = 4, 3, 32
    H3 = 3 * H

    key = jax.random.PRNGKey(0)
    ks = jax.random.split(key, 12)

    def init(k, shape, scale=0.2):
        return (scale * jax.random.normal(k, shape)).astype(jnp.float32)

    params = {
        # encoder GRU (input dim D_in) -- gates [r|z|n] concatenated on lanes,
        # stored pre-transposed for x @ W
        "enc_wih": init(ks[0], (D_in, H3)),
        "enc_whh": init(ks[1], (H, H3)),
        "enc_bih": init(ks[2], (1, H3)),
        "enc_bhh": init(ks[3], (1, H3)),
        # decoder GRU (input dim D_out); recurrent weights carry the output
        # head as extra columns: [Whh_r|z|n | W_out], [bhh_r|z|n | b_out]
        "dec_wih": init(ks[4], (D_out, H3)),
        "dec_bih": init(ks[5], (1, H3)),
        "dec_whh_ext": init(ks[6], (H, H3 + D_out)),
        "dec_bhh_ext": init(ks[7], (1, H3 + D_out)),
    }

    in_seq = init(ks[8], (B, T_in, D_in), scale=1.0)
    out_seq = init(ks[9], (B, T_out, D_out), scale=1.0)

    # Teacher-forcing decisions: random.random() < ratio, per step (fixed seed),
    # drawn host-side exactly like the torch forward, then baked in as statics.
    random.seed(0)
    teacher_forcing_ratio = 0.5
    tf_flags = tuple(1 if random.random() < teacher_forcing_ratio else 0
                     for _ in range(T_out))

    result = seq2seq_forward_jit(params, in_seq, out_seq, tf_flags)
    result = jax.block_until_ready(result)

    ref = seq2seq_reference(params, in_seq, out_seq, tf_flags)
    assert result.shape == (B, T_out, D_out)
    assert jnp.allclose(result, ref, rtol=1e-3, atol=1e-4), "mismatch vs reference"

    print("KERNEL_OK")
</pallas_src>

<mosaic_0001>
module attributes {stable_mosaic.version = 11 : i64} {
  func.func @seq2seq_kernel(%arg0: memref<48x4xf32, #tpu.memory_space<vmem>>, %arg1: memref<5x8x3xf32, #tpu.memory_space<vmem>>, %arg2: memref<4x96xf32, #tpu.memory_space<vmem>>, %arg3: memref<32x96xf32, #tpu.memory_space<vmem>>, %arg4: memref<1x96xf32, #tpu.memory_space<vmem>>, %arg5: memref<1x96xf32, #tpu.memory_space<vmem>>, %arg6: memref<3x96xf32, #tpu.memory_space<vmem>>, %arg7: memref<1x96xf32, #tpu.memory_space<vmem>>, %arg8: memref<32x99xf32, #tpu.memory_space<vmem>>, %arg9: memref<1x99xf32, #tpu.memory_space<vmem>>, %arg10: memref<5x8x3xf32, #tpu.memory_space<vmem>>) attributes {dimension_semantics = [], scalar_prefetch = 0 : i64, scratch_operands = 0 : i64, tpu.core_type = #tpu.core_type<tc>} {
    %c0 = arith.constant 0 : index
    %c0_0 = arith.constant 0 : index
    %0 = vector.load %arg3[%c0, %c0_0] : memref<32x96xf32, #tpu.memory_space<vmem>>, vector<32x96xf32>
    %c0_1 = arith.constant 0 : index
    %c0_2 = arith.constant 0 : index
    %1 = vector.load %arg5[%c0_1, %c0_2] : memref<1x96xf32, #tpu.memory_space<vmem>>, vector<1x96xf32>
    %c0_3 = arith.constant 0 : index
    %c0_4 = arith.constant 0 : index
    %2 = vector.load %arg0[%c0_3, %c0_4] : memref<48x4xf32, #tpu.memory_space<vmem>>, vector<48x4xf32>
    %c0_5 = arith.constant 0 : index
    %c0_6 = arith.constant 0 : index
    %3 = vector.load %arg2[%c0_5, %c0_6] : memref<4x96xf32, #tpu.memory_space<vmem>>, vector<4x96xf32>
    %cst = arith.constant dense<0.000000e+00> : vector<48x96xf32>
    %4 = tpu.matmul %2, %3, %cst {dimension_numbers = #tpu.dot_dimension_numbers<[1], [0], [0], [1], [0, 0, 1, 1], [], []>} : vector<48x4xf32>, vector<4x96xf32>, vector<48x96xf32> -> vector<48x96xf32>
    %c0_7 = arith.constant 0 : index
    %c0_8 = arith.constant 0 : index
    %5 = vector.load %arg4[%c0_7, %c0_8] : memref<1x96xf32, #tpu.memory_space<vmem>>, vector<1x96xf32>
    %6 = vector.broadcast %5 : vector<1x96xf32> to vector<48x96xf32>
    %7 = arith.addf %4, %6 : vector<48x96xf32>
    %cst_9 = arith.constant 0.000000e+00 : f32
    %8 = vector.broadcast %cst_9 : f32 to vector<8x32xf32>
    %9 = vector.extract_strided_slice %7 {offsets = [0, 0], sizes = [8, 96], strides = [1, 1]} : vector<48x96xf32> to vector<8x96xf32>
    %cst_10 = arith.constant dense<0.000000e+00> : vector<8x96xf32>
    %10 = tpu.matmul %8, %0, %cst_10 {dimension_numbers = #tpu.dot_dimension_numbers<[1], [0], [0], [1], [0, 0, 1, 1], [], []>} : vector<8x32xf32>, vector<32x96xf32>, vector<8x96xf32> -> vector<8x96xf32>
    %11 = vector.broadcast %1 : vector<1x96xf32> to vector<8x96xf32>
    %12 = arith.addf %10, %11 : vector<8x96xf32>
    %13 = vector.extract_strided_slice %9 {offsets = [0, 0], sizes = [8, 64], strides = [1, 1]} : vector<8x96xf32> to vector<8x64xf32>
    %14 = vector.extract_strided_slice %12 {offsets = [0, 0], sizes = [8, 64], strides = [1, 1]} : vector<8x96xf32> to vector<8x64xf32>
    %15 = arith.addf %13, %14 : vector<8x64xf32>
    %16 = arith.negf %15 : vector<8x64xf32>
    %17 = math.exp %16 : vector<8x64xf32>
    %cst_11 = arith.constant 1.000000e+00 : f32
    %18 = vector.broadcast %cst_11 : f32 to vector<8x64xf32>
    %19 = arith.addf %18, %17 : vector<8x64xf32>
    %20 = arith.divf %18, %19 : vector<8x64xf32>
    %21 = vector.extract_strided_slice %20 {offsets = [0, 0], sizes = [8, 32], strides = [1, 1]} : vector<8x64xf32> to vector<8x32xf32>
    %22 = vector.extract_strided_slice %20 {offsets = [0, 32], sizes = [8, 32], strides = [1, 1]} : vector<8x64xf32> to vector<8x32xf32>
    %23 = vector.extract_strided_slice %9 {offsets = [0, 64], sizes = [8, 32], strides = [1, 1]} : vector<8x96xf32> to vector<8x32xf32>
    %24 = vector.extract_strided_slice %12 {offsets = [0, 64], sizes = [8, 32], strides = [1, 1]} : vector<8x96xf32> to vector<8x32xf32>
    %25 = arith.mulf %21, %24 : vector<8x32xf32>
    %26 = arith.addf %23, %25 : vector<8x32xf32>
    %27 = math.tanh %26 : vector<8x32xf32>
    %cst_12 = arith.constant 1.000000e+00 : f32
    %28 = vector.broadcast %cst_12 : f32 to vector<8x32xf32>
    %29 = arith.subf %28, %22 : vector<8x32xf32>
    %30 = arith.mulf %29, %27 : vector<8x32xf32>
    %31 = arith.mulf %22, %8 : vector<8x32xf32>
    %32 = arith.addf %30, %31 : vector<8x32xf32>
    %33 = vector.extract_strided_slice %7 {offsets = [8, 0], sizes = [8, 96], strides = [1, 1]} : vector<48x96xf32> to vector<8x96xf32>
    %cst_13 = arith.constant dense<0.000000e+00> : vector<8x96xf32>
    %34 = tpu.matmul %32, %0, %cst_13 {dimension_numbers = #tpu.dot_dimension_numbers<[1], [0], [0], [1], [0, 0, 1, 1], [], []>} : vector<8x32xf32>, vector<32x96xf32>, vector<8x96xf32> -> vector<8x96xf32>
    %35 = vector.broadcast %1 : vector<1x96xf32> to vector<8x96xf32>
    %36 = arith.addf %34, %35 : vector<8x96xf32>
    %37 = vector.extract_strided_slice %33 {offsets = [0, 0], sizes = [8, 64], strides = [1, 1]} : vector<8x96xf32> to vector<8x64xf32>
    %38 = vector.extract_strided_slice %36 {offsets = [0, 0], sizes = [8, 64], strides = [1, 1]} : vector<8x96xf32> to vector<8x64xf32>
    %39 = arith.addf %37, %38 : vector<8x64xf32>
    %40 = arith.negf %39 : vector<8x64xf32>
    %41 = math.exp %40 : vector<8x64xf32>
    %cst_14 = arith.constant 1.000000e+00 : f32
    %42 = vector.broadcast %cst_14 : f32 to vector<8x64xf32>
    %43 = arith.addf %42, %41 : vector<8x64xf32>
    %44 = arith.divf %42, %43 : vector<8x64xf32>
    %45 = vector.extract_strided_slice %44 {offsets = [0, 0], sizes = [8, 32], strides = [1, 1]} : vector<8x64xf32> to vector<8x32xf32>
    %46 = vector.extract_strided_slice %44 {offsets = [0, 32], sizes = [8, 32], strides = [1, 1]} : vector<8x64xf32> to vector<8x32xf32>
    %47 = vector.extract_strided_slice %33 {offsets = [0, 64], sizes = [8, 32], strides = [1, 1]} : vector<8x96xf32> to vector<8x32xf32>
    %48 = vector.extract_strided_slice %36 {offsets = [0, 64], sizes = [8, 32], strides = [1, 1]} : vector<8x96xf32> to vector<8x32xf32>
    %49 = arith.mulf %45, %48 : vector<8x32xf32>
    %50 = arith.addf %47, %49 : vector<8x32xf32>
    %51 = math.tanh %50 : vector<8x32xf32>
    %cst_15 = arith.constant 1.000000e+00 : f32
    %52 = vector.broadcast %cst_15 : f32 to vector<8x32xf32>
    %53 = arith.subf %52, %46 : vector<8x32xf32>
    %54 = arith.mulf %53, %51 : vector<8x32xf32>
    %55 = arith.mulf %46, %32 : vector<8x32xf32>
    %56 = arith.addf %54, %55 : vector<8x32xf32>
    %57 = vector.extract_strided_slice %7 {offsets = [16, 0], sizes = [8, 96], strides = [1, 1]} : vector<48x96xf32> to vector<8x96xf32>
    %cst_16 = arith.constant dense<0.000000e+00> : vector<8x96xf32>
    %58 = tpu.matmul %56, %0, %cst_16 {dimension_numbers = #tpu.dot_dimension_numbers<[1], [0], [0], [1], [0, 0, 1, 1], [], []>} : vector<8x32xf32>, vector<32x96xf32>, vector<8x96xf32> -> vector<8x96xf32>
    %59 = vector.broadcast %1 : vector<1x96xf32> to vector<8x96xf32>
    %60 = arith.addf %58, %59 : vector<8x96xf32>
    %61 = vector.extract_strided_slice %57 {offsets = [0, 0], sizes = [8, 64], strides = [1, 1]} : vector<8x96xf32> to vector<8x64xf32>
    %62 = vector.extract_strided_slice %60 {offsets = [0, 0], sizes = [8, 64], strides = [1, 1]} : vector<8x96xf32> to vector<8x64xf32>
    %63 = arith.addf %61, %62 : vector<8x64xf32>
    %64 = arith.negf %63 : vector<8x64xf32>
    %65 = math.exp %64 : vector<8x64xf32>
    %cst_17 = arith.constant 1.000000e+00 : f32
    %66 = vector.broadcast %cst_17 : f32 to vector<8x64xf32>
    %67 = arith.addf %66, %65 : vector<8x64xf32>
    %68 = arith.divf %66, %67 : vector<8x64xf32>
    %69 = vector.extract_strided_slice %68 {offsets = [0, 0], sizes = [8, 32], strides = [1, 1]} : vector<8x64xf32> to vector<8x32xf32>
    %70 = vector.extract_strided_slice %68 {offsets = [0, 32], sizes = [8, 32], strides = [1, 1]} : vector<8x64xf32> to vector<8x32xf32>
    %71 = vector.extract_strided_slice %57 {offsets = [0, 64], sizes = [8, 32], strides = [1, 1]} : vector<8x96xf32> to vector<8x32xf32>
    %72 = vector.extract_strided_slice %60 {offsets = [0, 64], sizes = [8, 32], strides = [1, 1]} : vector<8x96xf32> to vector<8x32xf32>
    %73 = arith.mulf %69, %72 : vector<8x32xf32>
    %74 = arith.addf %71, %73 : vector<8x32xf32>
    %75 = math.tanh %74 : vector<8x32xf32>
    %cst_18 = arith.constant 1.000000e+00 : f32
    %76 = vector.broadcast %cst_18 : f32 to vector<8x32xf32>
    %77 = arith.subf %76, %70 : vector<8x32xf32>
    %78 = arith.mulf %77, %75 : vector<8x32xf32>
    %79 = arith.mulf %70, %56 : vector<8x32xf32>
    %80 = arith.addf %78, %79 : vector<8x32xf32>
    %81 = vector.extract_strided_slice %7 {offsets = [24, 0], sizes = [8, 96], strides = [1, 1]} : vector<48x96xf32> to vector<8x96xf32>
    %cst_19 = arith.constant dense<0.000000e+00> : vector<8x96xf32>
    %82 = tpu.matmul %80, %0, %cst_19 {dimension_numbers = #tpu.dot_dimension_numbers<[1], [0], [0], [1], [0, 0, 1, 1], [], []>} : vector<8x32xf32>, vector<32x96xf32>, vector<8x96xf32> -> vector<8x96xf32>
    %83 = vector.broadcast %1 : vector<1x96xf32> to vector<8x96xf32>
    %84 = arith.addf %82, %83 : vector<8x96xf32>
    %85 = vector.extract_strided_slice %81 {offsets = [0, 0], sizes = [8, 64], strides = [1, 1]} : vector<8x96xf32> to vector<8x64xf32>
    %86 = vector.extract_strided_slice %84 {offsets = [0, 0], sizes = [8, 64], strides = [1, 1]} : vector<8x96xf32> to vector<8x64xf32>
    %87 = arith.addf %85, %86 : vector<8x64xf32>
    %88 = arith.negf %87 : vector<8x64xf32>
    %89 = math.exp %88 : vector<8x64xf32>
    %cst_20 = arith.constant 1.000000e+00 : f32
    %90 = vector.broadcast %cst_20 : f32 to vector<8x64xf32>
    %91 = arith.addf %90, %89 : vector<8x64xf32>
    %92 = arith.divf %90, %91 : vector<8x64xf32>
    %93 = vector.extract_strided_slice %92 {offsets = [0, 0], sizes = [8, 32], strides = [1, 1]} : vector<8x64xf32> to vector<8x32xf32>
    %94 = vector.extract_strided_slice %92 {offsets = [0, 32], sizes = [8, 32], strides = [1, 1]} : vector<8x64xf32> to vector<8x32xf32>
    %95 = vector.extract_strided_slice %81 {offsets = [0, 64], sizes = [8, 32], strides = [1, 1]} : vector<8x96xf32> to vector<8x32xf32>
    %96 = vector.extract_strided_slice %84 {offsets = [0, 64], sizes = [8, 32], strides = [1, 1]} : vector<8x96xf32> to vector<8x32xf32>
    %97 = arith.mulf %93, %96 : vector<8x32xf32>
    %98 = arith.addf %95, %97 : vector<8x32xf32>
    %99 = math.tanh %98 : vector<8x32xf32>
    %cst_21 = arith.constant 1.000000e+00 : f32
    %100 = vector.broadcast %cst_21 : f32 to vector<8x32xf32>
    %101 = arith.subf %100, %94 : vector<8x32xf32>
    %102 = arith.mulf %101, %99 : vector<8x32xf32>
    %103 = arith.mulf %94, %80 : vector<8x32xf32>
    %104 = arith.addf %102, %103 : vector<8x32xf32>
    %105 = vector.extract_strided_slice %7 {offsets = [32, 0], sizes = [8, 96], strides = [1, 1]} : vector<48x96xf32> to vector<8x96xf32>
    %cst_22 = arith.constant dense<0.000000e+00> : vector<8x96xf32>
    %106 = tpu.matmul %104, %0, %cst_22 {dimension_numbers = #tpu.dot_dimension_numbers<[1], [0], [0], [1], [0, 0, 1, 1], [], []>} : vector<8x32xf32>, vector<32x96xf32>, vector<8x96xf32> -> vector<8x96xf32>
    %107 = vector.broadcast %1 : vector<1x96xf32> to vector<8x96xf32>
    %108 = arith.addf %106, %107 : vector<8x96xf32>
    %109 = vector.extract_strided_slice %105 {offsets = [0, 0], sizes = [8, 64], strides = [1, 1]} : vector<8x96xf32> to vector<8x64xf32>
    %110 = vector.extract_strided_slice %108 {offsets = [0, 0], sizes = [8, 64], strides = [1, 1]} : vector<8x96xf32> to vector<8x64xf32>
    %111 = arith.addf %109, %110 : vector<8x64xf32>
    %112 = arith.negf %111 : vector<8x64xf32>
    %113 = math.exp %112 : vector<8x64xf32>
    %cst_23 = arith.constant 1.000000e+00 : f32
    %114 = vector.broadcast %cst_23 : f32 to vector<8x64xf32>
    %115 = arith.addf %114, %113 : vector<8x64xf32>
    %116 = arith.divf %114, %115 : vector<8x64xf32>
    %117 = vector.extract_strided_slice %116 {offsets = [0, 0], sizes = [8, 32], strides = [1, 1]} : vector<8x64xf32> to vector<8x32xf32>
    %118 = vector.extract_strided_slice %116 {offsets = [0, 32], sizes = [8, 32], strides = [1, 1]} : vector<8x64xf32> to vector<8x32xf32>
    %119 = vector.extract_strided_slice %105 {offsets = [0, 64], sizes = [8, 32], strides = [1, 1]} : vector<8x96xf32> to vector<8x32xf32>
    %120 = vector.extract_strided_slice %108 {offsets = [0, 64], sizes = [8, 32], strides = [1, 1]} : vector<8x96xf32> to vector<8x32xf32>
    %121 = arith.mulf %117, %120 : vector<8x32xf32>
    %122 = arith.addf %119, %121 : vector<8x32xf32>
    %123 = math.tanh %122 : vector<8x32xf32>
    %cst_24 = arith.constant 1.000000e+00 : f32
    %124 = vector.broadcast %cst_24 : f32 to vector<8x32xf32>
    %125 = arith.subf %124, %118 : vector<8x32xf32>
    %126 = arith.mulf %125, %123 : vector<8x32xf32>
    %127 = arith.mulf %118, %104 : vector<8x32xf32>
    %128 = arith.addf %126, %127 : vector<8x32xf32>
    %129 = vector.extract_strided_slice %7 {offsets = [40, 0], sizes = [8, 96], strides = [1, 1]} : vector<48x96xf32> to vector<8x96xf32>
    %cst_25 = arith.constant dense<0.000000e+00> : vector<8x96xf32>
    %130 = tpu.matmul %128, %0, %cst_25 {dimension_numbers = #tpu.dot_dimension_numbers<[1], [0], [0], [1], [0, 0, 1, 1], [], []>} : vector<8x32xf32>, vector<32x96xf32>, vector<8x96xf32> -> vector<8x96xf32>
    %131 = vector.broadcast %1 : vector<1x96xf32> to vector<8x96xf32>
    %132 = arith.addf %130, %131 : vector<8x96xf32>
    %133 = vector.extract_strided_slice %129 {offsets = [0, 0], sizes = [8, 64], strides = [1, 1]} : vector<8x96xf32> to vector<8x64xf32>
    %134 = vector.extract_strided_slice %132 {offsets = [0, 0], sizes = [8, 64], strides = [1, 1]} : vector<8x96xf32> to vector<8x64xf32>
    %135 = arith.addf %133, %134 : vector<8x64xf32>
    %136 = arith.negf %135 : vector<8x64xf32>
    %137 = math.exp %136 : vector<8x64xf32>
    %cst_26 = arith.constant 1.000000e+00 : f32
    %138 = vector.broadcast %cst_26 : f32 to vector<8x64xf32>
    %139 = arith.addf %138, %137 : vector<8x64xf32>
    %140 = arith.divf %138, %139 : vector<8x64xf32>
    %141 = vector.extract_strided_slice %140 {offsets = [0, 0], sizes = [8, 32], strides = [1, 1]} : vector<8x64xf32> to vector<8x32xf32>
    %142 = vector.extract_strided_slice %140 {offsets = [0, 32], sizes = [8, 32], strides = [1, 1]} : vector<8x64xf32> to vector<8x32xf32>
    %143 = vector.extract_strided_slice %129 {offsets = [0, 64], sizes = [8, 32], strides = [1, 1]} : vector<8x96xf32> to vector<8x32xf32>
    %144 = vector.extract_strided_slice %132 {offsets = [0, 64], sizes = [8, 32], strides = [1, 1]} : vector<8x96xf32> to vector<8x32xf32>
    %145 = arith.mulf %141, %144 : vector<8x32xf32>
    %146 = arith.addf %143, %145 : vector<8x32xf32>
    %147 = math.tanh %146 : vector<8x32xf32>
    %cst_27 = arith.constant 1.000000e+00 : f32
    %148 = vector.broadcast %cst_27 : f32 to vector<8x32xf32>
    %149 = arith.subf %148, %142 : vector<8x32xf32>
    %150 = arith.mulf %149, %147 : vector<8x32xf32>
    %151 = arith.mulf %142, %128 : vector<8x32xf32>
    %152 = arith.addf %150, %151 : vector<8x32xf32>
    %c0_28 = arith.constant 0 : index
    %c0_29 = arith.constant 0 : index
    %153 = vector.load %arg6[%c0_28, %c0_29] : memref<3x96xf32, #tpu.memory_space<vmem>>, vector<3x96xf32>
    %c0_30 = arith.constant 0 : index
    %c0_31 = arith.constant 0 : index
    %154 = vector.load %arg7[%c0_30, %c0_31] : memref<1x96xf32, #tpu.memory_space<vmem>>, vector<1x96xf32>
    %c0_32 = arith.constant 0 : index
    %c0_33 = arith.constant 0 : index
    %155 = vector.load %arg8[%c0_32, %c0_33] : memref<32x99xf32, #tpu.memory_space<vmem>>, vector<32x99xf32>
    %c0_34 = arith.constant 0 : index
    %c0_35 = arith.constant 0 : index
    %156 = vector.load %arg9[%c0_34, %c0_35] : memref<1x99xf32, #tpu.memory_space<vmem>>, vector<1x99xf32>
    %cst_36 = arith.constant -1.000000e+00 : f32
    %157 = vector.broadcast %cst_36 : f32 to vector<8x3xf32>
    %cst_37 = arith.constant dense<0.000000e+00> : vector<8x99xf32>
    %158 = tpu.matmul %152, %155, %cst_37 {dimension_numbers = #tpu.dot_dimension_numbers<[1], [0], [0], [1], [0, 0, 1, 1], [], []>} : vector<8x32xf32>, vector<32x99xf32>, vector<8x99xf32> -> vector<8x99xf32>
    %159 = vector.broadcast %156 : vector<1x99xf32> to vector<8x99xf32>
    %160 = arith.addf %158, %159 : vector<8x99xf32>
    %cst_38 = arith.constant dense<0.000000e+00> : vector<8x96xf32>
    %161 = tpu.matmul %157, %153, %cst_38 {dimension_numbers = #tpu.dot_dimension_numbers<[1], [0], [0], [1], [0, 0, 1, 1], [], []>} : vector<8x3xf32>, vector<3x96xf32>, vector<8x96xf32> -> vector<8x96xf32>
    %162 = vector.broadcast %154 : vector<1x96xf32> to vector<8x96xf32>
    %163 = arith.addf %161, %162 : vector<8x96xf32>
    %164 = vector.extract_strided_slice %160 {offsets = [0, 0], sizes = [8, 96], strides = [1, 1]} : vector<8x99xf32> to vector<8x96xf32>
    %165 = vector.extract_strided_slice %163 {offsets = [0, 0], sizes = [8, 64], strides = [1, 1]} : vector<8x96xf32> to vector<8x64xf32>
    %166 = vector.extract_strided_slice %164 {offsets = [0, 0], sizes = [8, 64], strides = [1, 1]} : vector<8x96xf32> to vector<8x64xf32>
    %167 = arith.addf %165, %166 : vector<8x64xf32>
    %168 = arith.negf %167 : vector<8x64xf32>
    %169 = math.exp %168 : vector<8x64xf32>
    %cst_39 = arith.constant 1.000000e+00 : f32
    %170 = vector.broadcast %cst_39 : f32 to vector<8x64xf32>
    %171 = arith.addf %170, %169 : vector<8x64xf32>
    %172 = arith.divf %170, %171 : vector<8x64xf32>
    %173 = vector.extract_strided_slice %172 {offsets = [0, 0], sizes = [8, 32], strides = [1, 1]} : vector<8x64xf32> to vector<8x32xf32>
    %174 = vector.extract_strided_slice %172 {offsets = [0, 32], sizes = [8, 32], strides = [1, 1]} : vector<8x64xf32> to vector<8x32xf32>
    %175 = vector.extract_strided_slice %163 {offsets = [0, 64], sizes = [8, 32], strides = [1, 1]} : vector<8x96xf32> to vector<8x32xf32>
    %176 = vector.extract_strided_slice %164 {offsets = [0, 64], sizes = [8, 32], strides = [1, 1]} : vector<8x96xf32> to vector<8x32xf32>
    %177 = arith.mulf %173, %176 : vector<8x32xf32>
    %178 = arith.addf %175, %177 : vector<8x32xf32>
    %179 = math.tanh %178 : vector<8x32xf32>
    %cst_40 = arith.constant 1.000000e+00 : f32
    %180 = vector.broadcast %cst_40 : f32 to vector<8x32xf32>
    %181 = arith.subf %180, %174 : vector<8x32xf32>
    %182 = arith.mulf %181, %179 : vector<8x32xf32>
    %183 = arith.mulf %174, %152 : vector<8x32xf32>
    %184 = arith.addf %182, %183 : vector<8x32xf32>
    %cst_41 = arith.constant dense<0.000000e+00> : vector<8x99xf32>
    %185 = tpu.matmul %184, %155, %cst_41 {dimension_numbers = #tpu.dot_dimension_numbers<[1], [0], [0], [1], [0, 0, 1, 1], [], []>} : vector<8x32xf32>, vector<32x99xf32>, vector<8x99xf32> -> vector<8x99xf32>
    %186 = vector.broadcast %156 : vector<1x99xf32> to vector<8x99xf32>
    %187 = arith.addf %185, %186 : vector<8x99xf32>
    %188 = vector.extract_strided_slice %187 {offsets = [0, 96], sizes = [8, 3], strides = [1, 1]} : vector<8x99xf32> to vector<8x3xf32>
    %c0_42 = arith.constant 0 : index
    %c0_43 = arith.constant 0 : index
    %c0_44 = arith.constant 0 : index
    %189 = vector.load %arg10[%c0_42, %c0_43, %c0_44] : memref<5x8x3xf32, #tpu.memory_space<vmem>>, vector<1x8x3xf32>
    %190 = vector.shape_cast %189 : vector<1x8x3xf32> to vector<8x3xf32>
    %191 = vector.shape_cast %188 : vector<8x3xf32> to vector<1x8x3xf32>
    tpu.vector_store %arg10[%c0_42, %c0_43, %c0_44], %191 {strides = array<i32>} : memref<5x8x3xf32, #tpu.memory_space<vmem>>, vector<1x8x3xf32>,
    %cst_45 = arith.constant dense<0.000000e+00> : vector<8x96xf32>
    %192 = tpu.matmul %188, %153, %cst_45 {dimension_numbers = #tpu.dot_dimension_numbers<[1], [0], [0], [1], [0, 0, 1, 1], [], []>} : vector<8x3xf32>, vector<3x96xf32>, vector<8x96xf32> -> vector<8x96xf32>
    %193 = vector.broadcast %154 : vector<1x96xf32> to vector<8x96xf32>
    %194 = arith.addf %192, %193 : vector<8x96xf32>
    %195 = vector.extract_strided_slice %187 {offsets = [0, 0], sizes = [8, 96], strides = [1, 1]} : vector<8x99xf32> to vector<8x96xf32>
    %196 = vector.extract_strided_slice %194 {offsets = [0, 0], sizes = [8, 64], strides = [1, 1]} : vector<8x96xf32> to vector<8x64xf32>
    %197 = vector.extract_strided_slice %195 {offsets = [0, 0], sizes = [8, 64], strides = [1, 1]} : vector<8x96xf32> to vector<8x64xf32>
    %198 = arith.addf %196, %197 : vector<8x64xf32>
    %199 = arith.negf %198 : vector<8x64xf32>
    %200 = math.exp %199 : vector<8x64xf32>
    %cst_46 = arith.constant 1.000000e+00 : f32
    %201 = vector.broadcast %cst_46 : f32 to vector<8x64xf32>
    %202 = arith.addf %201, %200 : vector<8x64xf32>
    %203 = arith.divf %201, %202 : vector<8x64xf32>
    %204 = vector.extract_strided_slice %203 {offsets = [0, 0], sizes = [8, 32], strides = [1, 1]} : vector<8x64xf32> to vector<8x32xf32>
    %205 = vector.extract_strided_slice %203 {offsets = [0, 32], sizes = [8, 32], strides = [1, 1]} : vector<8x64xf32> to vector<8x32xf32>
    %206 = vector.extract_strided_slice %194 {offsets = [0, 64], sizes = [8, 32], strides = [1, 1]} : vector<8x96xf32> to vector<8x32xf32>
    %207 = vector.extract_strided_slice %195 {offsets = [0, 64], sizes = [8, 32], strides = [1, 1]} : vector<8x96xf32> to vector<8x32xf32>
    %208 = arith.mulf %204, %207 : vector<8x32xf32>
    %209 = arith.addf %206, %208 : vector<8x32xf32>
    %210 = math.tanh %209 : vector<8x32xf32>
    %cst_47 = arith.constant 1.000000e+00 : f32
    %211 = vector.broadcast %cst_47 : f32 to vector<8x32xf32>
    %212 = arith.subf %211, %205 : vector<8x32xf32>
    %213 = arith.mulf %212, %210 : vector<8x32xf32>
    %214 = arith.mulf %205, %184 : vector<8x32xf32>
    %215 = arith.addf %213, %214 : vector<8x32xf32>
    %cst_48 = arith.constant dense<0.000000e+00> : vector<8x99xf32>
    %216 = tpu.matmul %215, %155, %cst_48 {dimension_numbers = #tpu.dot_dimension_numbers<[1], [0], [0], [1], [0, 0, 1, 1], [], []>} : vector<8x32xf32>, vector<32x99xf32>, vector<8x99xf32> -> vector<8x99xf32>
    %217 = vector.broadcast %156 : vector<1x99xf32> to vector<8x99xf32>
    %218 = arith.addf %216, %217 : vector<8x99xf32>
    %219 = vector.extract_strided_slice %218 {offsets = [0, 96], sizes = [8, 3], strides = [1, 1]} : vector<8x99xf32> to vector<8x3xf32>
    %c1 = arith.constant 1 : index
    %c0_49 = arith.constant 0 : index
    %c0_50 = arith.constant 0 : index
    %220 = vector.load %arg10[%c1, %c0_49, %c0_50] : memref<5x8x3xf32, #tpu.memory_space<vmem>>, vector<1x8x3xf32>
    %221 = vector.shape_cast %220 : vector<1x8x3xf32> to vector<8x3xf32>
    %222 = vector.shape_cast %219 : vector<8x3xf32> to vector<1x8x3xf32>
    tpu.vector_store %arg10[%c1, %c0_49, %c0_50], %222 {strides = array<i32>} : memref<5x8x3xf32, #tpu.memory_space<vmem>>, vector<1x8x3xf32>,
    %cst_51 = arith.constant dense<0.000000e+00> : vector<8x96xf32>
    %223 = tpu.matmul %219, %153, %cst_51 {dimension_numbers = #tpu.dot_dimension_numbers<[1], [0], [0], [1], [0, 0, 1, 1], [], []>} : vector<8x3xf32>, vector<3x96xf32>, vector<8x96xf32> -> vector<8x96xf32>
    %224 = vector.broadcast %154 : vector<1x96xf32> to vector<8x96xf32>
    %225 = arith.addf %223, %224 : vector<8x96xf32>
    %226 = vector.extract_strided_slice %218 {offsets = [0, 0], sizes = [8, 96], strides = [1, 1]} : vector<8x99xf32> to vector<8x96xf32>
    %227 = vector.extract_strided_slice %225 {offsets = [0, 0], sizes = [8, 64], strides = [1, 1]} : vector<8x96xf32> to vector<8x64xf32>
    %228 = vector.extract_strided_slice %226 {offsets = [0, 0], sizes = [8, 64], strides = [1, 1]} : vector<8x96xf32> to vector<8x64xf32>
    %229 = arith.addf %227, %228 : vector<8x64xf32>
    %230 = arith.negf %229 : vector<8x64xf32>
    %231 = math.exp %230 : vector<8x64xf32>
    %cst_52 = arith.constant 1.000000e+00 : f32
    %232 = vector.broadcast %cst_52 : f32 to vector<8x64xf32>
    %233 = arith.addf %232, %231 : vector<8x64xf32>
    %234 = arith.divf %232, %233 : vector<8x64xf32>
    %235 = vector.extract_strided_slice %234 {offsets = [0, 0], sizes = [8, 32], strides = [1, 1]} : vector<8x64xf32> to vector<8x32xf32>
    %236 = vector.extract_strided_slice %234 {offsets = [0, 32], sizes = [8, 32], strides = [1, 1]} : vector<8x64xf32> to vector<8x32xf32>
    %237 = vector.extract_strided_slice %225 {offsets = [0, 64], sizes = [8, 32], strides = [1, 1]} : vector<8x96xf32> to vector<8x32xf32>
    %238 = vector.extract_strided_slice %226 {offsets = [0, 64], sizes = [8, 32], strides = [1, 1]} : vector<8x96xf32> to vector<8x32xf32>
    %239 = arith.mulf %235, %238 : vector<8x32xf32>
    %240 = arith.addf %237, %239 : vector<8x32xf32>
    %241 = math.tanh %240 : vector<8x32xf32>
    %cst_53 = arith.constant 1.000000e+00 : f32
    %242 = vector.broadcast %cst_53 : f32 to vector<8x32xf32>
    %243 = arith.subf %242, %236 : vector<8x32xf32>
    %244 = arith.mulf %243, %241 : vector<8x32xf32>
    %245 = arith.mulf %236, %215 : vector<8x32xf32>
    %246 = arith.addf %244, %245 : vector<8x32xf32>
    %cst_54 = arith.constant dense<0.000000e+00> : vector<8x99xf32>
    %247 = tpu.matmul %246, %155, %cst_54 {dimension_numbers = #tpu.dot_dimension_numbers<[1], [0], [0], [1], [0, 0, 1, 1], [], []>} : vector<8x32xf32>, vector<32x99xf32>, vector<8x99xf32> -> vector<8x99xf32>
    %248 = vector.broadcast %156 : vector<1x99xf32> to vector<8x99xf32>
    %249 = arith.addf %247, %248 : vector<8x99xf32>
    %250 = vector.extract_strided_slice %249 {offsets = [0, 96], sizes = [8, 3], strides = [1, 1]} : vector<8x99xf32> to vector<8x3xf32>
    %c2 = arith.constant 2 : index
    %c0_55 = arith.constant 0 : index
    %c0_56 = arith.constant 0 : index
    %251 = vector.load %arg10[%c2, %c0_55, %c0_56] : memref<5x8x3xf32, #tpu.memory_space<vmem>>, vector<1x8x3xf32>
    %252 = vector.shape_cast %251 : vector<1x8x3xf32> to vector<8x3xf32>
    %253 = vector.shape_cast %250 : vector<8x3xf32> to vector<1x8x3xf32>
    tpu.vector_store %arg10[%c2, %c0_55, %c0_56], %253 {strides = array<i32>} : memref<5x8x3xf32, #tpu.memory_space<vmem>>, vector<1x8x3xf32>,
    %c2_57 = arith.constant 2 : index
    %c0_58 = arith.constant 0 : index
    %c0_59 = arith.constant 0 : index
    %254 = vector.load %arg1[%c2_57, %c0_58, %c0_59] : memref<5x8x3xf32, #tpu.memory_space<vmem>>, vector<1x8x3xf32>
    %255 = vector.shape_cast %254 : vector<1x8x3xf32> to vector<8x3xf32>
    %cst_60 = arith.constant dense<0.000000e+00> : vector<8x96xf32>
    %256 = tpu.matmul %255, %153, %cst_60 {dimension_numbers = #tpu.dot_dimension_numbers<[1], [0], [0], [1], [0, 0, 1, 1], [], []>} : vector<8x3xf32>, vector<3x96xf32>, vector<8x96xf32> -> vector<8x96xf32>
    %257 = vector.broadcast %154 : vector<1x96xf32> to vector<8x96xf32>
    %258 = arith.addf %256, %257 : vector<8x96xf32>
    %259 = vector.extract_strided_slice %249 {offsets = [0, 0], sizes = [8, 96], strides = [1, 1]} : vector<8x99xf32> to vector<8x96xf32>
    %260 = vector.extract_strided_slice %258 {offsets = [0, 0], sizes = [8, 64], strides = [1, 1]} : vector<8x96xf32> to vector<8x64xf32>
    %261 = vector.extract_strided_slice %259 {offsets = [0, 0], sizes = [8, 64], strides = [1, 1]} : vector<8x96xf32> to vector<8x64xf32>
    %262 = arith.addf %260, %261 : vector<8x64xf32>
    %263 = arith.negf %262 : vector<8x64xf32>
    %264 = math.exp %263 : vector<8x64xf32>
    %cst_61 = arith.constant 1.000000e+00 : f32
    %265 = vector.broadcast %cst_61 : f32 to vector<8x64xf32>
    %266 = arith.addf %265, %264 : vector<8x64xf32>
    %267 = arith.divf %265, %266 : vector<8x64xf32>
    %268 = vector.extract_strided_slice %267 {offsets = [0, 0], sizes = [8, 32], strides = [1, 1]} : vector<8x64xf32> to vector<8x32xf32>
    %269 = vector.extract_strided_slice %267 {offsets = [0, 32], sizes = [8, 32], strides = [1, 1]} : vector<8x64xf32> to vector<8x32xf32>
    %270 = vector.extract_strided_slice %258 {offsets = [0, 64], sizes = [8, 32], strides = [1, 1]} : vector<8x96xf32> to vector<8x32xf32>
    %271 = vector.extract_strided_slice %259 {offsets = [0, 64], sizes = [8, 32], strides = [1, 1]} : vector<8x96xf32> to vector<8x32xf32>
    %272 = arith.mulf %268, %271 : vector<8x32xf32>
    %273 = arith.addf %270, %272 : vector<8x32xf32>
    %274 = math.tanh %273 : vector<8x32xf32>
    %cst_62 = arith.constant 1.000000e+00 : f32
    %275 = vector.broadcast %cst_62 : f32 to vector<8x32xf32>
    %276 = arith.subf %275, %269 : vector<8x32xf32>
    %277 = arith.mulf %276, %274 : vector<8x32xf32>
    %278 = arith.mulf %269, %246 : vector<8x32xf32>
    %279 = arith.addf %277, %278 : vector<8x32xf32>
    %cst_63 = arith.constant dense<0.000000e+00> : vector<8x99xf32>
    %280 = tpu.matmul %279, %155, %cst_63 {dimension_numbers = #tpu.dot_dimension_numbers<[1], [0], [0], [1], [0, 0, 1, 1], [], []>} : vector<8x32xf32>, vector<32x99xf32>, vector<8x99xf32> -> vector<8x99xf32>
    %281 = vector.broadcast %156 : vector<1x99xf32> to vector<8x99xf32>
    %282 = arith.addf %280, %281 : vector<8x99xf32>
    %283 = vector.extract_strided_slice %282 {offsets = [0, 96], sizes = [8, 3], strides = [1, 1]} : vector<8x99xf32> to vector<8x3xf32>
    %c3 = arith.constant 3 : index
    %c0_64 = arith.constant 0 : index
    %c0_65 = arith.constant 0 : index
    %284 = vector.load %arg10[%c3, %c0_64, %c0_65] : memref<5x8x3xf32, #tpu.memory_space<vmem>>, vector<1x8x3xf32>
    %285 = vector.shape_cast %284 : vector<1x8x3xf32> to vector<8x3xf32>
    %286 = vector.shape_cast %283 : vector<8x3xf32> to vector<1x8x3xf32>
    tpu.vector_store %arg10[%c3, %c0_64, %c0_65], %286 {strides = array<i32>} : memref<5x8x3xf32, #tpu.memory_space<vmem>>, vector<1x8x3xf32>,
    %c3_66 = arith.constant 3 : index
    %c0_67 = arith.constant 0 : index
    %c0_68 = arith.constant 0 : index
    %287 = vector.load %arg1[%c3_66, %c0_67, %c0_68] : memref<5x8x3xf32, #tpu.memory_space<vmem>>, vector<1x8x3xf32>
    %288 = vector.shape_cast %287 : vector<1x8x3xf32> to vector<8x3xf32>
    %cst_69 = arith.constant dense<0.000000e+00> : vector<8x96xf32>
    %289 = tpu.matmul %288, %153, %cst_69 {dimension_numbers = #tpu.dot_dimension_numbers<[1], [0], [0], [1], [0, 0, 1, 1], [], []>} : vector<8x3xf32>, vector<3x96xf32>, vector<8x96xf32> -> vector<8x96xf32>
    %290 = vector.broadcast %154 : vector<1x96xf32> to vector<8x96xf32>
    %291 = arith.addf %289, %290 : vector<8x96xf32>
    %292 = vector.extract_strided_slice %282 {offsets = [0, 0], sizes = [8, 96], strides = [1, 1]} : vector<8x99xf32> to vector<8x96xf32>
    %293 = vector.extract_strided_slice %291 {offsets = [0, 0], sizes = [8, 64], strides = [1, 1]} : vector<8x96xf32> to vector<8x64xf32>
    %294 = vector.extract_strided_slice %292 {offsets = [0, 0], sizes = [8, 64], strides = [1, 1]} : vector<8x96xf32> to vector<8x64xf32>
    %295 = arith.addf %293, %294 : vector<8x64xf32>
    %296 = arith.negf %295 : vector<8x64xf32>
    %297 = math.exp %296 : vector<8x64xf32>
    %cst_70 = arith.constant 1.000000e+00 : f32
    %298 = vector.broadcast %cst_70 : f32 to vector<8x64xf32>
    %299 = arith.addf %298, %297 : vector<8x64xf32>
    %300 = arith.divf %298, %299 : vector<8x64xf32>
    %301 = vector.extract_strided_slice %300 {offsets = [0, 0], sizes = [8, 32], strides = [1, 1]} : vector<8x64xf32> to vector<8x32xf32>
    %302 = vector.extract_strided_slice %300 {offsets = [0, 32], sizes = [8, 32], strides = [1, 1]} : vector<8x64xf32> to vector<8x32xf32>
    %303 = vector.extract_strided_slice %291 {offsets = [0, 64], sizes = [8, 32], strides = [1, 1]} : vector<8x96xf32> to vector<8x32xf32>
    %304 = vector.extract_strided_slice %292 {offsets = [0, 64], sizes = [8, 32], strides = [1, 1]} : vector<8x96xf32> to vector<8x32xf32>
    %305 = arith.mulf %301, %304 : vector<8x32xf32>
    %306 = arith.addf %303, %305 : vector<8x32xf32>
    %307 = math.tanh %306 : vector<8x32xf32>
    %cst_71 = arith.constant 1.000000e+00 : f32
    %308 = vector.broadcast %cst_71 : f32 to vector<8x32xf32>
    %309 = arith.subf %308, %302 : vector<8x32xf32>
    %310 = arith.mulf %309, %307 : vector<8x32xf32>
    %311 = arith.mulf %302, %279 : vector<8x32xf32>
    %312 = arith.addf %310, %311 : vector<8x32xf32>
    %313 = vector.extract_strided_slice %155 {offsets = [0, 96], sizes = [32, 3], strides = [1, 1]} : vector<32x99xf32> to vector<32x3xf32>
    %cst_72 = arith.constant dense<0.000000e+00> : vector<8x3xf32>
    %314 = tpu.matmul %312, %313, %cst_72 {dimension_numbers = #tpu.dot_dimension_numbers<[1], [0], [0], [1], [0, 0, 1, 1], [], []>} : vector<8x32xf32>, vector<32x3xf32>, vector<8x3xf32> -> vector<8x3xf32>
    %315 = vector.extract_strided_slice %156 {offsets = [0, 96], sizes = [1, 3], strides = [1, 1]} : vector<1x99xf32> to vector<1x3xf32>
    %316 = vector.broadcast %315 : vector<1x3xf32> to vector<8x3xf32>
    %317 = arith.addf %314, %316 : vector<8x3xf32>
    %c4 = arith.constant 4 : index
    %c0_73 = arith.constant 0 : index
    %c0_74 = arith.constant 0 : index
    %318 = vector.load %arg10[%c4, %c0_73, %c0_74] : memref<5x8x3xf32, #tpu.memory_space<vmem>>, vector<1x8x3xf32>
    %319 = vector.shape_cast %318 : vector<1x8x3xf32> to vector<8x3xf32>
    %320 = vector.shape_cast %317 : vector<8x3xf32> to vector<1x8x3xf32>
    tpu.vector_store %arg10[%c4, %c0_73, %c0_74], %320 {strides = array<i32>} : memref<5x8x3xf32, #tpu.memory_space<vmem>>, vector<1x8x3xf32>,
    return
  }
}

</mosaic_0001>

<bundles_post_ra>
// kernel: seq2seq_forward.1
= control target key start
LH: loop header
LB: loop body
LE: loop exit
PB: predicated region body
PF: predicated region fallthrough
CT: control target
= control target key end

     0   :  { %vm73_vm0 = vcmask 1043456   ;;  %vm54_vm1 = vcmask 31744   ;;  %v2247_v0 = vmov 0.0|0.0   ;;  %vm2248_vm2 = vmmov 0   ;;  %s2250_s27 = smov 64   ;;  %s2251_s16 = smov 96   ;;  %s2637_s3 = inlined_call_operand.vmem [shape: f32[32,96], index: 3, kind: input, shape index: {}]   ;;  %s2638_s2 = inlined_call_operand.vmem [shape: f32[4,96], index: 2, kind: input, shape index: {}]   ;;  %s2639_s0 = inlined_call_operand.vmem [shape: f32[48,4], index: 0, kind: input, shape index: {}]   ;;  %s2640_s5 = inlined_call_operand.vmem [shape: f32[1,96], index: 5, kind: input, shape index: {}]   ;;  %s2641_s4 = inlined_call_operand.vmem [shape: f32[1,96], index: 4, kind: input, shape index: {}]   ;;  %s2642_s8 = inlined_call_operand.vmem [shape: f32[32,99], index: 8, kind: input, shape index: {}]   ;;  %s2643_s6 = inlined_call_operand.vmem [shape: f32[3,96], index: 6, kind: input, shape index: {}]   ;;  %s2644_s9 = inlined_call_operand.vmem [shape: f32[1,99], index: 9, kind: input, shape index: {}]   ;;  %s2645_s7 = inlined_call_operand.vmem [shape: f32[1,96], index: 7, kind: input, shape index: {}]   ;;  %s2646_s10 = inlined_call_operand.vmem [shape: f32[5,8,3], index: 10, kind: output, shape index: {}]   ;;  %s2647_s1 = inlined_call_operand.vmem [shape: f32[5,8,3], index: 1, kind: input, shape index: {}]  }
   0x1   :  { %2092 = vmatprep.subr.bf16.mxu1 %v2247_v0  ;;  %v35_v1 = vld [vmem:[%s2637_s3] sm:$0xff]  ;;  %v36_v2 = vld [vmem:[%s2637_s3 + $0x8] sm:$0xff]  ;;  %v37_v5 = vld [vmem:[%s2637_s3 + $0x10] sm:$0xff]  ;;  %v2249_v8 = vmov 0.0   ;;  %vm178_vm3 = vcmask 261120   ;;  %vm881_vm4 = vcmask 1042432  }
   0x2   :  { %v46_v3 = vld [vmem:[%s2638_s2] sm:$0xf]  ;;  %v2319_v4 = vpack.c.bf16 %v36_v2, %v35_v1  ;;  %v38_v6 = vld [vmem:[%s2637_s3 + $0x18] sm:$0xff]  ;;  %1943 = vmatprep.mubr.msk.f32.mxu1 %vm2248_vm2, %v2249_v8  ;;  %v41_v9 = vld [vmem:[%s2639_s0 + $0x8] sm:$0xff]  ;;  %vm877_vm5 = vcmask 23552  }
   0x3   :  { %1924 = vmatprep.subr.msk.mxu0 %vm73_vm0, %v46_v3  ;;  %v40_v7 = vld [vmem:[%s2639_s0] sm:$0xff]  ;;  %v2339_v10 = vpack.c.bf16 %v38_v6, %v37_v5  ;;  %v42_v28 = vld [vmem:[%s2639_s0 + $0x10] sm:$0xff]  ;;  %v43_v29 = vld [vmem:[%s2639_s0 + $0x18] sm:$0xff] }
   0x4   :  { %1925 = vmatpush3.msk.msra.mxu0 %vm73_vm0, %v46_v3  ;;  %1926 = vmatprep.mubr.msk.f32.mxu0 %vm54_vm1, %v40_v7  ;;  %v2360_v13 = vld [vmem:[%s2640_s5] ss:$0 sm:$0xff]  ;;  %v45_v31 = vld [vmem:[%s2639_s0 + $0x28] sm:$0xff] }
   0x5   :  { %2094 = vmatpush3.bf16.msra.mxu1 %v2319_v4  ;;  %1927 = vmatmul.mubr.msk.f32.vlgmr.msra.gmra.mrb[0].mxu0 %vm54_vm1, %v41_v9  ;;  %v2367_v17 = vld [vmem:[%s2641_s4] ss:$0 sm:$0xff] }
   0x6   :  { %2095 = vmatprep.subr.bf16.mxu1 %v2247_v0  ;;  %2098 = vmatprep.subr.bf16.mxu0 %v2247_v0  ;;  %v44_v30 = vld [vmem:[%s2639_s0 + $0x20] sm:$0xff] }
   0x7   :  { %2100 = vmatpush3.bf16.msra.mxu0 %v2319_v4  ;;  %1929 = vmatprep.mubr.msk.f32.mxu0 %vm54_vm1, %v42_v28 }
   0x8   :  { %2101 = vmatprep.subr.bf16.mxu0 %v2247_v0 }
   0x9   :  { %2097 = vmatpush3.bf16.msra.mxu1 %v2339_v10  ;;  %1930 = vmatmul.mubr.msk.f32.gmra.mrb[2].mxu0 %vm54_vm1, %v43_v29 }
   0xa   :  { %2104 = vmatprep.subr.bf16.mxu1 %v2247_v0  ;;  %1932 = vmatprep.mubr.msk.f32.mxu0 %vm54_vm1, %v44_v30 }
   0xb   :  { %2103 = vmatpush3.bf16.msra.mxu0 %v2339_v10 }
   0xc   :  { %1944 = vmatmul.mubr.f32.vlgmr.msra.gmra.mrb[0].mxu1 %v2249_v8  ;;  %2110 = vmatprep.subr.bf16.mxu0 %v2247_v0 }
   0xd   :  { %2106 = vmatpush3.bf16.msra.mxu1 %v2319_v4  ;;  %1965 = vmatprep.mubr.msk.f32.mxu1 %vm2248_vm2, %v2249_v8 }
   0xe   :  { %2107 = vmatprep.subr.bf16.mxu1 %v2247_v0  ;;  %1933 = vmatmul.mubr.msk.f32.gmra.mrb[4].mxu0 %vm54_vm1, %v45_v31 }
   0xf   :  { %1954 = vmatprep.mubr.msk.f32.mxu0 %vm2248_vm2, %v2249_v8 }
  0x11   :  { %2109 = vmatpush3.bf16.msra.mxu1 %v2339_v10 }
  0x12   :  { %2116 = vmatprep.subr.bf16.mxu1 %v2247_v0 }
  0xd8   :  { %v1928_v11 = vpop.f32.mrb[0].mxu0 }
  0xd9   :  { %v143_v12 = vpop.f32.mrb[1].mxu0  ;;  %v149_v46 = vadd.f32 %v1928_v11, %v2367_v17 }
  0xda   :  { %v144_v18 = vadd.f32 %v2367_v17, %v143_v12 }
  0xdc   :  { %v2391_v38 = vpop.f32.mrb[2].mxu0 }
  0xdd   :  { %v153_v39 = vpop.f32.mrb[3].mxu0  ;;  %v159_v28 = vadd.f32 %v2391_v38, %v2367_v17 }
  0xde   :  { %v154_v3 = vadd.f32 %v2367_v17, %v153_v39 }
  0xdf   :  { %v248_v14 = vpop.f32.mrb[0].mxu1 }
  0xe0   :  { %v249_v15 = vadd.f32 %v2360_v13, %v248_v14  ;;  %v1945_v16 = vpop.f32.mrb[1].mxu1 }
  0xe1   :  { %v2393_v40 = vpop.f32.mrb[4].mxu0 }
  0xe2   :  { %260 = vrot.lane.b32.xlu0 %v249_v15, %s2250_s27  ;;  %v252_v19 = vadd.f32 %v249_v15, %v144_v18  ;;  %v2395_v41 = vpop.f32.mrb[5].mxu0 }
  0xe4   :  { %v1807_v20 = vmul.f32 -1.442695, %v252_v19 }
  0xe6   :  { %2181 = vpow2.f32 %v1807_v20 }
  0xf0   :  { %v2182_v21 = vpop.eup %2181 }
  0xf1   :  { %v256_v22 = vadd.f32 1.0, %v2182_v21 }
  0xf3   :  { %2183 = vrcp.f32 %v256_v22 }
  0xfd   :  { %v2184_v23 = vpop.eup %2183 }
  0xfe   :  { %v270_v33 = vsub.f32 1.0, %v2184_v23  ;;  %v276_v35 = vmul.f32 0.0, %v2184_v23 }
 0x154   :  { %v261_v24 = vpop.permute.xlu0 %260 }
 0x155   :  { %v263_v25 = vmul.f32 %v2184_v23, %v261_v24 }
 0x157   :  { %265 = vrot.lane.b32.xlu0 %v263_v25, %s2250_s27 }
 0x1c9   :  { %v266_v26 = vpop.permute.xlu0 %265 }
 0x1ca   :  { %v268_v27 = vadd.f32 %v266_v26, %v144_v18 }
 0x1cc   :  { %2185 = vtanh.f32 %v268_v27 }
 0x1d6   :  { %v2186_v32 = vpop.eup %2185 }
 0x1d7   :  { %272 = vrot.lane.b32.xlu1 %v2186_v32, %s2251_s16 }
 0x249   :  { %v273_v34 = vpop.permute.xlu1 %272 }
 0x24a   :  { %v275_v36 = vmul.f32 %v273_v34, %v270_v33 }
 0x24c   :  { %v277_v37 = vadd.f32 %v276_v35, %v275_v36 }
 0x24e   :  { %279 = vrot.lane.b32.xlu1 %v277_v37, %s2251_s16 }
 0x2c0   :  { %v280_v42 = vpop.permute.xlu1 %279 }
 0x2c1   :  { %1955 = vmatmul.mubr.msk.f32.vlgmr.msra.gmra.mrb[6].mxu0 %vm178_vm3, %v280_v42 }
 0x2c2   :  { %2112 = vmatpush3.bf16.msra.mxu0 %v2319_v4  ;;  %1976 = vmatprep.mubr.msk.f32.mxu0 %vm2248_vm2, %v2249_v8 }
 0x2c3   :  { %2113 = vmatprep.subr.bf16.mxu0 %v2247_v0 }
 0x2c6   :  { %2115 = vmatpush3.bf16.msra.mxu0 %v2339_v10 }
 0x2c7   :  { %2122 = vmatprep.subr.bf16.mxu0 %v2247_v0 }
 0x394   :  { %v349_v43 = vpop.f32.mrb[6].mxu0 }
 0x395   :  { %v350_v44 = vadd.f32 %v2360_v13, %v349_v43  ;;  %v1956_v45 = vpop.f32.mrb[7].mxu0 }
 0x397   :  { %361 = vrot.lane.b32.xlu0 %v350_v44, %s2250_s27  ;;  %v353_v47 = vadd.f32 %v350_v44, %v149_v46 }
 0x399   :  { %v1809_v48 = vmul.f32 -1.442695, %v353_v47 }
 0x39b   :  { %2187 = vpow2.f32 %v1809_v48  ;;  %v164_v48 = vadd.f32 %v2367_v17, %v2395_v41 }
 0x3a5   :  { %v2188_v49 = vpop.eup %2187 }
 0x3a6   :  { %v357_v50 = vadd.f32 1.0, %v2188_v49 }
 0x3a8   :  { %2189 = vrcp.f32 %v357_v50 }
 0x3b2   :  { %v2190_v51 = vpop.eup %2189 }
 0x3b3   :  { %v371_v57 = vsub.f32 1.0, %v2190_v51  ;;  %v377_v59 = vmul.f32 %v2190_v51, %v277_v37 }
 0x409   :  { %v362_v52 = vpop.permute.xlu0 %361 }
 0x40a   :  { %v364_v53 = vmul.f32 %v2190_v51, %v362_v52 }
 0x40c   :  { %366 = vrot.lane.b32.xlu1 %v364_v53, %s2250_s27 }
 0x47e   :  { %v367_v54 = vpop.permute.xlu1 %366 }
 0x47f   :  { %v369_v55 = vadd.f32 %v367_v54, %v149_v46 }
 0x481   :  { %2191 = vtanh.f32 %v369_v55 }
 0x48b   :  { %v2192_v56 = vpop.eup %2191 }
 0x48c   :  { %373 = vrot.lane.b32.xlu0 %v2192_v56, %s2251_s16 }
 0x4fe   :  { %v374_v58 = vpop.permute.xlu0 %373 }
 0x4ff   :  { %v376_v60 = vmul.f32 %v374_v58, %v371_v57 }
 0x501   :  { %v378_v61 = vadd.f32 %v377_v59, %v376_v60 }
 0x503   :  { %380 = vrot.lane.b32.xlu1 %v378_v61, %s2251_s16 }
 0x575   :  { %v381_v62 = vpop.permute.xlu1 %380 }
 0x576   :  { %1966 = vmatmul.mubr.msk.f32.vlgmr.msra.gmra.mrb[2].mxu1 %vm178_vm3, %v381_v62 }
 0x577   :  { %2118 = vmatpush3.bf16.msra.mxu1 %v2319_v4  ;;  %1987 = vmatprep.mubr.msk.f32.mxu1 %vm2248_vm2, %v2249_v8 }
 0x578   :  { %2119 = vmatprep.subr.bf16.mxu1 %v2247_v0 }
 0x57b   :  { %2121 = vmatpush3.bf16.msra.mxu1 %v2339_v10 }
 0x57c   :  { %2128 = vmatprep.subr.bf16.mxu1 %v2247_v0 }
 0x649   :  { %v450_v63 = vpop.f32.mrb[2].mxu1 }
 0x64a   :  { %v451_v1 = vadd.f32 %v2360_v13, %v450_v63  ;;  %v1967_v2 = vpop.f32.mrb[3].mxu1 }
 0x64c   :  { %462 = vrot.lane.b32.xlu0 %v451_v1, %s2250_s27  ;;  %v454_v5 = vadd.f32 %v451_v1, %v154_v3 }
 0x64e   :  { %v1811_v6 = vmul.f32 -1.442695, %v454_v5  ;;  %v169_v5 = vadd.f32 %v2393_v40, %v2367_v17  ;;  %v2463_v17 = vld [vmem:[%s2642_s8 + $0x8] sm:$0xff]  ;;  %v2468_v40 = vld [vmem:[%s2642_s8 + $0x10] sm:$0xff] }
 0x650   :  { %2193 = vpow2.f32 %v1811_v6 }
 0x65a   :  { %v2194_v7 = vpop.eup %2193 }
 0x65b   :  { %v458_v9 = vadd.f32 1.0, %v2194_v7 }
 0x65d   :  { %2195 = vrcp.f32 %v458_v9 }
 0x667   :  { %v2196_v11 = vpop.eup %2195 }
 0x668   :  { %v472_v19 = vsub.f32 1.0, %v2196_v11  ;;  %v478_v21 = vmul.f32 %v2196_v11, %v378_v61 }
 0x6be   :  { %v463_v12 = vpop.permute.xlu0 %462 }
 0x6bf   :  { %v465_v14 = vmul.f32 %v2196_v11, %v463_v12 }
 0x6c1   :  { %467 = vrot.lane.b32.xlu1 %v465_v14, %s2250_s27 }
 0x733   :  { %v468_v15 = vpop.permute.xlu1 %467 }
 0x734   :  { %v470_v16 = vadd.f32 %v468_v15, %v154_v3 }
 0x736   :  { %2197 = vtanh.f32 %v470_v16 }
 0x740   :  { %v2198_v18 = vpop.eup %2197 }
 0x741   :  { %474 = vrot.lane.b32.xlu0 %v2198_v18, %s2251_s16 }
 0x7b3   :  { %v475_v20 = vpop.permute.xlu0 %474 }
 0x7b4   :  { %v477_v22 = vmul.f32 %v475_v20, %v472_v19  ;;  %v2477_v20 = vld [vmem:[%s2642_s8 + $0x18] sm:$0xff] }
 0x7b6   :  { %v479_v23 = vadd.f32 %v478_v21, %v477_v22  ;;  %v2482_v21 = vld [vmem:[%s2643_s6] sm:$0x7]  ;;  %v2489_v22 = vpack.c.bf16 %v2477_v20, %v2468_v40 }
 0x7b8   :  { %481 = vrot.lane.b32.xlu1 %v479_v23, %s2251_s16 }
 0x82a   :  { %v482_v24 = vpop.permute.xlu1 %481 }
 0x82b   :  { %1977 = vmatmul.mubr.msk.f32.vlgmr.msra.gmra.mrb[8].mxu0 %vm178_vm3, %v482_v24  ;;  %v2252_v24 = vmov -1.0  }
 0x82c   :  { %2124 = vmatpush3.bf16.msra.mxu0 %v2319_v4  ;;  %1998 = vmatprep.mubr.msk.f32.mxu0 %vm2248_vm2, %v2249_v8 }
 0x82d   :  { %2125 = vmatprep.subr.bf16.mxu0 %v2247_v0 }
 0x830   :  { %2127 = vmatpush3.bf16.msra.mxu0 %v2339_v10 }
 0x831   :  { %2012 = vmatprep.subr.mxu0 %v2249_v8 }
 0x8fe   :  { %v551_v25 = vpop.f32.mrb[8].mxu0 }
 0x8ff   :  { %v552_v26 = vadd.f32 %v2360_v13, %v551_v25  ;;  %v1978_v27 = vpop.f32.mrb[9].mxu0 }
 0x901   :  { %563 = vrot.lane.b32.xlu0 %v552_v26, %s2250_s27  ;;  %v555_v29 = vadd.f32 %v552_v26, %v159_v28 }
 0x903   :  { %v1813_v4 = vmul.f32 -1.442695, %v555_v29 }
 0x905   :  { %2199 = vpow2.f32 %v1813_v4 }
 0x90f   :  { %v2200_v30 = vpop.eup %2199 }
 0x910   :  { %v559_v31 = vadd.f32 1.0, %v2200_v30 }
 0x912   :  { %2201 = vrcp.f32 %v559_v31 }
 0x91c   :  { %v2202_v32 = vpop.eup %2201 }
 0x91d   :  { %v573_v37 = vsub.f32 1.0, %v2202_v32  ;;  %v579_v38 = vmul.f32 %v2202_v32, %v479_v23 }
 0x973   :  { %v564_v33 = vpop.permute.xlu0 %563 }
 0x974   :  { %v566_v10 = vmul.f32 %v2202_v32, %v564_v33  ;;  %v2513_v32 = vld [vmem:[%s2644_s9] ss:$0 sm:$0xff] }
 0x976   :  { %568 = vrot.lane.b32.xlu1 %v566_v10, %s2250_s27 }
 0x9e8   :  { %v569_v34 = vpop.permute.xlu1 %568 }
 0x9e9   :  { %v571_v35 = vadd.f32 %v569_v34, %v159_v28 }
 0x9eb   :  { %2203 = vtanh.f32 %v571_v35  ;;  %v2520_v35 = vld [vmem:[%s2645_s7] ss:$0 sm:$0xff]  ;;  %s2253_s7 = smov 32  }
 0x9f5   :  { %v2204_v36 = vpop.eup %2203 }
 0x9f6   :  { %575 = vrot.lane.b32.xlu0 %v2204_v36, %s2251_s16 }
 0xa68   :  { %v576_v39 = vpop.permute.xlu0 %575 }
 0xa69   :  { %v578_v42 = vmul.f32 %v576_v39, %v573_v37 }
 0xa6b   :  { %v580_v43 = vadd.f32 %v579_v38, %v578_v42 }
 0xa6d   :  { %582 = vrot.lane.b32.xlu1 %v580_v43, %s2251_s16 }
 0xadf   :  { %v583_v44 = vpop.permute.xlu1 %582 }
 0xae0   :  { %1988 = vmatmul.mubr.msk.f32.vlgmr.msra.gmra.mrb[4].mxu1 %vm178_vm3, %v583_v44 }
 0xae1   :  { %2009 = vmatprep.mubr.msk.f32.mxu1 %vm2248_vm2, %v2249_v8 }
 0xbb3   :  { %v652_v45 = vpop.f32.mrb[4].mxu1 }
 0xbb4   :  { %v653_v46 = vadd.f32 %v2360_v13, %v652_v45  ;;  %v1989_v47 = vpop.f32.mrb[5].mxu1 }
 0xbb6   :  { %664 = vrot.lane.b32.xlu0 %v653_v46, %s2250_s27  ;;  %v656_v49 = vadd.f32 %v653_v46, %v164_v48 }
 0xbb8   :  { %v1815_v50 = vmul.f32 -1.442695, %v656_v49 }
 0xbba   :  { %2205 = vpow2.f32 %v1815_v50 }
 0xbc4   :  { %v2206_v51 = vpop.eup %2205 }
 0xbc5   :  { %v660_v52 = vadd.f32 1.0, %v2206_v51 }
 0xbc7   :  { %2207 = vrcp.f32 %v660_v52 }
 0xbd1   :  { %v2208_v53 = vpop.eup %2207 }
 0xbd2   :  { %v674_v59 = vsub.f32 1.0, %v2208_v53  ;;  %v680_v41 = vmul.f32 %v2208_v53, %v580_v43 }
 0xc28   :  { %v665_v54 = vpop.permute.xlu0 %664 }
 0xc29   :  { %v667_v55 = vmul.f32 %v2208_v53, %v665_v54 }
 0xc2b   :  { %669 = vrot.lane.b32.xlu1 %v667_v55, %s2250_s27 }
 0xc9d   :  { %v670_v56 = vpop.permute.xlu1 %669 }
 0xc9e   :  { %v672_v57 = vadd.f32 %v670_v56, %v164_v48 }
 0xca0   :  { %2209 = vtanh.f32 %v672_v57 }
 0xcaa   :  { %v2210_v58 = vpop.eup %2209 }
 0xcab   :  { %676 = vrot.lane.b32.xlu0 %v2210_v58, %s2251_s16 }
 0xd1d   :  { %v677_v60 = vpop.permute.xlu0 %676 }
 0xd1e   :  { %v679_v61 = vmul.f32 %v677_v60, %v674_v59 }
 0xd20   :  { %v681_v62 = vadd.f32 %v680_v41, %v679_v61 }
 0xd22   :  { %683 = vrot.lane.b32.xlu1 %v681_v62, %s2251_s16 }
 0xd94   :  { %v684_v63 = vpop.permute.xlu1 %683 }
 0xd95   :  { %1999 = vmatmul.mubr.msk.f32.vlgmr.msra.gmra.mrb[10].mxu0 %vm178_vm3, %v684_v63 }
 0xd96   :  { %2014 = vmatprep.mubr.msk.f32.mxu0 %vm2248_vm2, %v2249_v8  ;;  %2013 = vmatpush3.msk.msra.mxu0 %vm881_vm4, %v2482_v21 }
 0xd97   :  { %2028 = vmatprep.subr.mxu0 %v2249_v8 }
 0xd99   :  { %2015 = vmatmul.mubr.msk.f32.vlgmr.msra.gmra.mrb[12].mxu0 %vm877_vm5, %v2252_v24 }
 0xd9a   :  { %2029 = vmatpush3.msk.msra.mxu0 %vm881_vm4, %v2482_v21  ;;  %2030 = vmatprep.mubr.msk.f32.mxu0 %vm2248_vm2, %v2249_v8 }
 0xd9b   :  { %2140 = vmatprep.subr.bf16.mxu0 %v2247_v0 }
 0xe68   :  { %v753_v1 = vpop.f32.mrb[10].mxu0 }
 0xe69   :  { %v754_v2 = vadd.f32 %v2360_v13, %v753_v1  ;;  %v2000_v3 = vpop.f32.mrb[11].mxu0  ;;  %v2458_v13 = vld [vmem:[%s2642_s8] sm:$0xff] }
 0xe6a   :  { %v2472_v19 = vpack.c.bf16 %v2463_v17, %v2458_v13 }
 0xe6b   :  { %765 = vrot.lane.b32.xlu0 %v754_v2, %s2250_s27  ;;  %v757_v6 = vadd.f32 %v754_v2, %v169_v5 }
 0xe6c   :  { %2130 = vmatpush3.bf16.msra.mxu1 %v2472_v19  ;;  %v951_v30 = vpop.f32.mrb[12].mxu0 }
 0xe6d   :  { %v1817_v7 = vmul.f32 -1.442695, %v757_v6  ;;  %2131 = vmatprep.subr.bf16.mxu1 %v2247_v0  ;;  %v2016_v31 = vpop.f32.mrb[13].mxu0  ;;  %v952_v36 = vadd.f32 %v2520_v35, %v951_v30 }
 0xe6f   :  { %2211 = vpow2.f32 %v1817_v7 }
 0xe70   :  { %2133 = vmatpush3.bf16.msra.mxu1 %v2489_v22 }
 0xe71   :  { %2134 = vmatprep.subr.bf16.mxu1 %v2247_v0 }
 0xe79   :  { %v2212_v9 = vpop.eup %2211 }
 0xe7a   :  { %v761_v11 = vadd.f32 1.0, %v2212_v9 }
 0xe7c   :  { %2213 = vrcp.f32 %v761_v11 }
 0xe86   :  { %v2214_v12 = vpop.eup %2213 }
 0xe87   :  { %v775_v25 = vsub.f32 1.0, %v2214_v12  ;;  %v781_v27 = vmul.f32 %v2214_v12, %v681_v62 }
 0xedd   :  { %v766_v14 = vpop.permute.xlu0 %765 }
 0xede   :  { %v768_v15 = vmul.f32 %v2214_v12, %v766_v14 }
 0xee0   :  { %770 = vrot.lane.b32.xlu1 %v768_v15, %s2250_s27 }
 0xf52   :  { %v771_v16 = vpop.permute.xlu1 %770 }
 0xf53   :  { %v773_v18 = vadd.f32 %v771_v16, %v169_v5 }
 0xf55   :  { %2215 = vtanh.f32 %v773_v18 }
 0xf5f   :  { %v2216_v23 = vpop.eup %2215 }
 0xf60   :  { %777 = vrot.lane.b32.xlu0 %v2216_v23, %s2251_s16 }
 0xfd2   :  { %v778_v26 = vpop.permute.xlu0 %777 }
 0xfd3   :  { %v780_v28 = vmul.f32 %v778_v26, %v775_v25 }
 0xfd5   :  { %v782_v29 = vadd.f32 %v781_v27, %v780_v28 }
 0xfd7   :  { %797 = vrot.lane.b32.xlu1 %v782_v29, %s2251_s16 }
0x1049   :  { %v798_v4 = vpop.permute.xlu1 %797 }
0x104a   :  { %2010 = vmatmul.mubr.msk.f32.vlgmr.msra.gmra.mrb[6].mxu1 %vm178_vm3, %v798_v4 }
0x104b   :  { %2136 = vmatpush3.bf16.msra.mxu1 %v2472_v19  ;;  %2025 = vmatprep.mubr.msk.f32.mxu1 %vm2248_vm2, %v2249_v8 }
0x104c   :  { %2137 = vmatprep.subr.bf16.mxu1 %v2247_v0 }
0x104f   :  { %2139 = vmatpush3.bf16.msra.mxu1 %v2489_v22 }
0x1050   :  { %2146 = vmatprep.subr.bf16.mxu1 %v2247_v0 }
0x111d   :  { %v867_v33 = vpop.f32.mrb[6].mxu1 }
0x111e   :  { %v868_v10 = vadd.f32 %v2513_v32, %v867_v33  ;;  %v2011_v34 = vpop.f32.mrb[7].mxu1 }
0x1120   :  { %963 = vrot.lane.b32.xlu0 %v868_v10, %s2250_s27  ;;  %v955_v37 = vadd.f32 %v952_v36, %v868_v10 }
0x1122   :  { %v1823_v39 = vmul.f32 -1.442695, %v955_v37 }
0x1124   :  { %2217 = vpow2.f32 %v1823_v39 }
0x112e   :  { %v2218_v38 = vpop.eup %2217 }
0x112f   :  { %v959_v42 = vadd.f32 1.0, %v2218_v38 }
0x1131   :  { %2219 = vrcp.f32 %v959_v42  ;;  %v1835_v42 = vld [vmem:[%s2647_s1 + $0x10] sm:$0xff] }
0x113b   :  { %v2220_v43 = vpop.eup %2219 }
0x113c   :  { %v973_v49 = vsub.f32 1.0, %v2220_v43  ;;  %v979_v51 = vmul.f32 %v2220_v43, %v782_v29 }
0x1192   :  { %v964_v44 = vpop.permute.xlu0 %963 }
0x1193   :  { %v966_v45 = vmul.f32 %v2220_v43, %v964_v44 }
0x1195   :  { %968 = vrot.lane.b32.xlu1 %v966_v45, %s2250_s27 }
0x1207   :  { %v969_v46 = vpop.permute.xlu1 %968 }
0x1208   :  { %v971_v47 = vadd.f32 %v969_v46, %v952_v36 }
0x120a   :  { %2221 = vtanh.f32 %v971_v47 }
0x1214   :  { %v2222_v48 = vpop.eup %2221 }
0x1215   :  { %975 = vrot.lane.b32.xlu0 %v2222_v48, %s2251_s16 }
0x1287   :  { %v976_v50 = vpop.permute.xlu0 %975 }
0x1288   :  { %v978_v52 = vmul.f32 %v976_v50, %v973_v49 }
0x128a   :  { %v980_v53 = vadd.f32 %v979_v51, %v978_v52 }
0x128c   :  { %982 = vrot.lane.b32.xlu1 %v980_v53, %s2251_s16 }
0x12fe   :  { %v983_v54 = vpop.permute.xlu1 %982 }
0x12ff   :  { %2026 = vmatmul.mubr.msk.f32.vlgmr.msra.gmra.mrb[8].mxu1 %vm178_vm3, %v983_v54 }
0x1300   :  { %2148 = vmatpush3.bf16.msra.mxu1 %v2472_v19  ;;  %2057 = vmatprep.mubr.msk.f32.mxu1 %vm2248_vm2, %v2249_v8 }
0x1301   :  { %2149 = vmatprep.subr.bf16.mxu1 %v2247_v0 }
0x1304   :  { %2151 = vmatpush3.bf16.msra.mxu1 %v2489_v22 }
0x1305   :  { %2076 = vmatprep.subr.mxu1 %v2249_v8 }
0x13d2   :  { %v1052_v55 = vpop.f32.mrb[8].mxu1 }
0x13d3   :  { %v1053_v56 = vadd.f32 %v2513_v32, %v1052_v55  ;;  %v2027_v57 = vpop.f32.mrb[9].mxu1 }
0x13d5   :  { %1140 = vrot.lane.b32.xlu1 %v1053_v56, %s2250_s27  ;;  %1057 = vrot.lane.b32.xlu0 %v1053_v56, %s2253_s7 }
0x1447   :  { %v1058_v58 = vpop.permute.xlu0 %1057  ;;  %v1141_v3 = vpop.permute.xlu1 %1140 }
0x1448   :  { %1060 = vst.msk [vmem:[%s2646_s10] sm:$0xff] %vm877_vm5, %v1058_v58  ;;  %2031 = vmatmul.mubr.msk.f32.vlgmr.msra.gmra.mrb[14].mxu0 %vm877_vm5, %v1058_v58 }
0x1449   :  { %2142 = vmatpush3.bf16.msra.mxu0 %v2472_v19  ;;  %2041 = vmatprep.mubr.msk.f32.mxu0 %vm2248_vm2, %v2249_v8 }
0x144a   :  { %2143 = vmatprep.subr.bf16.mxu0 %v2247_v0 }
0x144d   :  { %2145 = vmatpush3.bf16.msra.mxu0 %v2489_v22 }
0x144e   :  { %2044 = vmatprep.subr.mxu0 %v2249_v8 }
0x151b   :  { %v1129_v59 = vpop.f32.mrb[14].mxu0 }
0x151c   :  { %v1130_v60 = vadd.f32 %v2520_v35, %v1129_v59  ;;  %v2032_v41 = vpop.f32.mrb[15].mxu0 }
0x151e   :  { %v1133_v61 = vadd.f32 %v1130_v60, %v1053_v56 }
0x1520   :  { %v1827_v62 = vmul.f32 -1.442695, %v1133_v61  ;;  %v1841_v61 = vld [vmem:[%s2647_s1 + $0x18] sm:$0xff] }
0x1522   :  { %2223 = vpow2.f32 %v1827_v62 }
0x152c   :  { %v2224_v63 = vpop.eup %2223 }
0x152d   :  { %v1137_v1 = vadd.f32 1.0, %v2224_v63 }
0x152f   :  { %2225 = vrcp.f32 %v1137_v1 }
0x1539   :  { %v2226_v2 = vpop.eup %2225 }
0x153a   :  { %v1143_v5 = vmul.f32 %v2226_v2, %v1141_v3  ;;  %v1150_v11 = vsub.f32 1.0, %v2226_v2  ;;  %v1156_v14 = vmul.f32 %v2226_v2, %v980_v53 }
0x153c   :  { %1145 = vrot.lane.b32.xlu0 %v1143_v5, %s2250_s27 }
0x15ae   :  { %v1146_v6 = vpop.permute.xlu0 %1145 }
0x15af   :  { %v1148_v7 = vadd.f32 %v1146_v6, %v1130_v60 }
0x15b1   :  { %2227 = vtanh.f32 %v1148_v7 }
0x15bb   :  { %v2228_v9 = vpop.eup %2227 }
0x15bc   :  { %1152 = vrot.lane.b32.xlu1 %v2228_v9, %s2251_s16 }
0x162e   :  { %v1153_v12 = vpop.permute.xlu1 %1152 }
0x162f   :  { %v1155_v15 = vmul.f32 %v1153_v12, %v1150_v11 }
0x1631   :  { %v1157_v16 = vadd.f32 %v1156_v14, %v1155_v15 }
0x1633   :  { %1159 = vrot.lane.b32.xlu0 %v1157_v16, %s2251_s16 }
0x16a5   :  { %v1160_v18 = vpop.permute.xlu0 %1159 }
0x16a6   :  { %2042 = vmatmul.mubr.msk.f32.vlgmr.msra.gmra.mrb[16].mxu0 %vm178_vm3, %v1160_v18 }
0x16a7   :  { %2045 = vmatpush3.msk.msra.mxu0 %vm881_vm4, %v2482_v21  ;;  %2046 = vmatprep.mubr.msk.f32.mxu0 %vm2248_vm2, %v2249_v8 }
0x16a8   :  { %2060 = vmatprep.subr.mxu0 %v2249_v8 }
0x1779   :  { %v1229_v23 = vpop.f32.mrb[16].mxu0 }
0x177a   :  { %v1230_v24 = vadd.f32 %v2513_v32, %v1229_v23  ;;  %v2043_v25 = vpop.f32.mrb[17].mxu0 }
0x177c   :  { %1318 = vrot.lane.b32.xlu0 %v1230_v24, %s2250_s27  ;;  %1234 = vrot.lane.b32.xlu1 %v1230_v24, %s2253_s7 }
0x17ee   :  { %v1235_v26 = vpop.permute.xlu1 %1234  ;;  %v1319_v34 = vpop.permute.xlu0 %1318 }
0x17ef   :  { %1829 = vst.msk [vmem:[%s2646_s10 + $0x8] sm:$0xff] %vm877_vm5, %v1235_v26  ;;  %2047 = vmatmul.mubr.msk.f32.vlgmr.msra.gmra.mrb[18].mxu0 %vm877_vm5, %v1235_v26  ;;  %v2171_v26 = vpack.i.bf16 %v2463_v17, %v2458_v13 }
0x17f0   :  { %2061 = vmatpush3.msk.msra.mxu0 %vm881_vm4, %v2482_v21  ;;  %2062 = vmatprep.mubr.msk.f32.mxu0 %vm2248_vm2, %v2249_v8 }
0x17f1   :  { %2152 = vmatprep.subr.bf16.mxu0 %v2247_v0 }
0x17f3   :  { %2063 = vmatmul.mubr.msk.f32.vlgmr.msra.gmra.mrb[20].mxu0 %vm877_vm5, %v1835_v42 }
0x17f4   :  { %2154 = vmatpush3.bf16.msra.mxu0 %v2472_v19  ;;  %2073 = vmatprep.mubr.msk.f32.mxu0 %vm2248_vm2, %v2249_v8 }
0x17f5   :  { %2155 = vmatprep.subr.bf16.mxu0 %v2247_v0 }
0x17f8   :  { %2157 = vmatpush3.bf16.msra.mxu0 %v2489_v22 }
0x18c2   :  { %v1307_v27 = vpop.f32.mrb[18].mxu0 }
0x18c3   :  { %v1308_v28 = vadd.f32 %v2520_v35, %v1307_v27  ;;  %v2048_v29 = vpop.f32.mrb[19].mxu0 }
0x18c4   :  { %v2176_v29 = vpack.i.bf16 %v2477_v20, %v2468_v40 }
0x18c5   :  { %v1311_v4 = vadd.f32 %v1308_v28, %v1230_v24 }
0x18c6   :  { %v1488_v19 = vpop.f32.mrb[20].mxu0 }
0x18c7   :  { %v1832_v30 = vmul.f32 -1.442695, %v1311_v4  ;;  %v2064_v22 = vpop.f32.mrb[21].mxu0  ;;  %v1489_v52 = vadd.f32 %v2520_v35, %v1488_v19 }
0x18c9   :  { %2229 = vpow2.f32 %v1832_v30 }
0x18d3   :  { %v2230_v31 = vpop.eup %2229 }
0x18d4   :  { %v1315_v33 = vadd.f32 1.0, %v2230_v31 }
0x18d6   :  { %2231 = vrcp.f32 %v1315_v33 }
0x18e0   :  { %v2232_v10 = vpop.eup %2231 }
0x18e1   :  { %v1321_v36 = vmul.f32 %v2232_v10, %v1319_v34  ;;  %v1328_v43 = vsub.f32 1.0, %v2232_v10  ;;  %v1334_v45 = vmul.f32 %v2232_v10, %v1157_v16 }
0x18e3   :  { %1323 = vrot.lane.b32.xlu1 %v1321_v36, %s2250_s27 }
0x1955   :  { %v1324_v37 = vpop.permute.xlu1 %1323 }
0x1956   :  { %v1326_v39 = vadd.f32 %v1324_v37, %v1308_v28 }
0x1958   :  { %2233 = vtanh.f32 %v1326_v39 }
0x1962   :  { %v2234_v38 = vpop.eup %2233 }
0x1963   :  { %1330 = vrot.lane.b32.xlu0 %v2234_v38, %s2251_s16 }
0x19d5   :  { %v1331_v44 = vpop.permute.xlu0 %1330 }
0x19d6   :  { %v1333_v46 = vmul.f32 %v1331_v44, %v1328_v43 }
0x19d8   :  { %v1335_v47 = vadd.f32 %v1334_v45, %v1333_v46 }
0x19da   :  { %1337 = vrot.lane.b32.xlu1 %v1335_v47, %s2251_s16 }
0x1a4c   :  { %v1338_v48 = vpop.permute.xlu1 %1337 }
0x1a4d   :  { %2058 = vmatmul.mubr.msk.f32.vlgmr.msra.gmra.mrb[10].mxu1 %vm178_vm3, %v1338_v48 }
0x1a4e   :  { %2077 = vmatpush3.msk.msra.mxu1 %vm881_vm4, %v2482_v21  ;;  %2078 = vmatprep.mubr.msk.f32.mxu1 %vm2248_vm2, %v2249_v8 }
0x1a4f   :  { %2158 = vmatprep.subr.bf16.mxu1 %v2247_v0 }
0x1a51   :  { %2079 = vmatmul.mubr.msk.f32.vlgmr.msra.gmra.mrb[12].mxu1 %vm877_vm5, %v1841_v61 }
0x1a52   :  { %2089 = vmatprep.mubr.msk.f32.mxu1 %vm2248_vm2, %v2249_v8 }
0x1b20   :  { %v1407_v49 = vpop.f32.mrb[10].mxu1 }
0x1b21   :  { %v2590_v50 = vadd.f32 %v2513_v32, %v1407_v49  ;;  %v2059_v51 = vpop.f32.mrb[11].mxu1 }
0x1b23   :  { %1499 = vrot.lane.b32.xlu0 %v2590_v50, %s2250_s27  ;;  %v1492_v53 = vadd.f32 %v1489_v52, %v2590_v50 }
0x1b24   :  { %v1669_v6 = vpop.f32.mrb[12].mxu1 }
0x1b25   :  { %v1838_v21 = vmul.f32 -1.442695, %v1492_v53  ;;  %v2080_v7 = vpop.f32.mrb[13].mxu1  ;;  %v1670_v8 = vadd.f32 %v2520_v35, %v1669_v6 }
0x1b27   :  { %2235 = vpow2.f32 %v1838_v21 }
0x1b31   :  { %v2236_v54 = vpop.eup %2235 }
0x1b32   :  { %v1496_v55 = vadd.f32 1.0, %v2236_v54 }
0x1b34   :  { %2237 = vrcp.f32 %v1496_v55 }
0x1b3e   :  { %v2238_v56 = vpop.eup %2237 }
0x1b3f   :  { %v1509_v62 = vsub.f32 1.0, %v2238_v56  ;;  %v1515_v1 = vmul.f32 %v2238_v56, %v1335_v47 }
0x1b95   :  { %v1500_v57 = vpop.permute.xlu0 %1499 }
0x1b96   :  { %v1502_v58 = vmul.f32 %v2238_v56, %v1500_v57 }
0x1b98   :  { %1504 = vrot.lane.b32.xlu1 %v1502_v58, %s2250_s27 }
0x1c0a   :  { %v1505_v59 = vpop.permute.xlu1 %1504 }
0x1c0b   :  { %v1507_v60 = vadd.f32 %v1505_v59, %v1489_v52 }
0x1c0d   :  { %2239 = vtanh.f32 %v1507_v60 }
0x1c17   :  { %v2240_v41 = vpop.eup %2239 }
0x1c18   :  { %1511 = vrot.lane.b32.xlu0 %v2240_v41, %s2251_s16 }
0x1c8a   :  { %v1512_v63 = vpop.permute.xlu0 %1511 }
0x1c8b   :  { %v1514_v2 = vmul.f32 %v1512_v63, %v1509_v62 }
0x1c8d   :  { %v1516_v3 = vadd.f32 %v1515_v1, %v1514_v2 }
0x1c8f   :  { %1518 = vrot.lane.b32.xlu1 %v1516_v3, %s2251_s16 }
0x1d01   :  { %v1519_v5 = vpop.permute.xlu1 %1518 }
0x1d02   :  { %2074 = vmatmul.mubr.msk.f32.vlgmr.msra.gmra.mrb[22].mxu0 %vm178_vm3, %v1519_v5 }
0x1dd5   :  { %v1588_v9 = vpop.f32.mrb[22].mxu0 }
0x1dd6   :  { %v1589_v11 = vadd.f32 %v2513_v32, %v1588_v9  ;;  %v2075_v12 = vpop.f32.mrb[23].mxu0 }
0x1dd8   :  { %1680 = vrot.lane.b32.xlu0 %v1589_v11, %s2250_s27  ;;  %v1673_v14 = vadd.f32 %v1670_v8, %v1589_v11 }
0x1dda   :  { %v1844_v15 = vmul.f32 -1.442695, %v1673_v14 }
0x1ddc   :  { %2241 = vpow2.f32 %v1844_v15 }
0x1de6   :  { %v2242_v16 = vpop.eup %2241 }
0x1de7   :  { %v1677_v18 = vadd.f32 1.0, %v2242_v16 }
0x1de9   :  { %2243 = vrcp.f32 %v1677_v18 }
0x1df3   :  { %v2244_v23 = vpop.eup %2243 }
0x1df4   :  { %v1690_v13 = vsub.f32 1.0, %v2244_v23  ;;  %v1696_v10 = vmul.f32 %v2244_v23, %v1516_v3 }
0x1e4a   :  { %v1681_v24 = vpop.permute.xlu0 %1680 }
0x1e4b   :  { %v1683_v25 = vmul.f32 %v2244_v23, %v1681_v24 }
0x1e4d   :  { %1685 = vrot.lane.b32.xlu1 %v1683_v25, %s2250_s27 }
0x1e51   :  { %2172 = vrot.lane.b32.xlu1 %v2171_v26, %s2253_s7 }
0x1ebf   :  { %v1686_v27 = vpop.permute.xlu1 %1685 }
0x1ec0   :  { %v1688_v28 = vadd.f32 %v1686_v27, %v1670_v8 }
0x1ec2   :  { %2245 = vtanh.f32 %v1688_v28 }
0x1ec3   :  { %v2173_v4 = vpop.permute.xlu1 %2172 }
0x1ec4   :  { %v2175_v30 = vunpack.i.h.bf16 %v2173_v4  ;;  %v2174_v31 = vunpack.i.l.bf16 %v2173_v4 }
0x1ec6   :  { %v2159_v33 = vpack.c.bf16 %v2175_v30, %v2174_v31 }
0x1ec8   :  { %2160 = vmatpush3.bf16.msra.mxu1 %v2159_v33 }
0x1ec9   :  { %2161 = vmatprep.subr.bf16.mxu1 %v2247_v0 }
0x1ecc   :  { %v2246_v35 = vpop.eup %2245 }
0x1ecd   :  { %1692 = vrot.lane.b32.xlu0 %v2246_v35, %s2251_s16 }
0x1ed1   :  { %2177 = vrot.lane.b32.xlu0 %v2176_v29, %s2253_s7 }
0x1ed5   :  { %1717 = vrot.lane.b32.xlu0 %v2513_v32, %s2253_s7 }
0x1ed9   :  { %1593 = vrot.lane.b32.xlu0 %v1589_v11, %s2253_s7 }
0x1f3f   :  { %v1693_v17 = vpop.permute.xlu0 %1692 }
0x1f40   :  { %v1695_v34 = vmul.f32 %v1693_v17, %v1690_v13 }
0x1f42   :  { %v1697_v36 = vadd.f32 %v1696_v10, %v1695_v34 }
0x1f43   :  { %v2178_v40 = vpop.permute.xlu0 %2177 }
0x1f44   :  { %v2180_v20 = vunpack.i.h.bf16 %v2178_v40  ;;  %v2179_v37 = vunpack.i.l.bf16 %v2178_v40  ;;  %1699 = vrot.lane.b32.xlu1 %v1697_v36, %s2251_s16 }
0x1f46   :  { %v2162_v39 = vpack.c.bf16 %v2180_v20, %v2179_v37 }
0x1f47   :  { %v1718_v38 = vpop.permute.xlu0 %1717 }
0x1f48   :  { %1412 = vrot.lane.b32.xlu1 %v2590_v50, %s2253_s7  ;;  %2163 = vmatpush3.bf16.msra.mxu1 %v2162_v39 }
0x1f4b   :  { %v1594_v0 = vpop.permute.xlu0 %1593 }
0x1f4c   :  { %1840 = vst.msk [vmem:[%s2646_s10 + $0x18] sm:$0xff] %vm877_vm5, %v1594_v0 }
0x1fb6   :  { %v1700_v32 = vpop.permute.xlu1 %1699 }
0x1fb7   :  { %2090 = vmatmul.mubr.msk.f32.vlgmr.msra.gmra.mrb[14].mxu1 %vm178_vm3, %v1700_v32 }
0x1fba   :  { %v1413_v42 = vpop.permute.xlu1 %1412 }
0x1fbb   :  { %1834 = vst.msk [vmem:[%s2646_s10 + $0x10] sm:$0xff] %vm877_vm5, %v1413_v42 }
0x208a   :  { %v1788_v43 = vpop.f32.mrb[14].mxu1 }
0x208b   :  { %v1789_v44 = vadd.f32 %v1788_v43, %v1718_v38  ;;  %v2091_v45 = vpop.f32.mrb[15].mxu1 }
0x208d   :  { %1846 = vst.msk [vmem:[%s2646_s10 + $0x20] sm:$0xff] %vm877_vm5, %v1789_v44 }

</bundles_post_ra>
